<compile_context>
chip_gen: v7x
topology: tpu7x:2x2x1
jax: 0.10.0
libtpu: 0.0.40
codegen_flags: <defaults>
</compile_context>

<pallas_src>
import jax
import jax.numpy as jnp
import numpy as np
from jax import lax
from jax.experimental import pallas as pl
from jax.experimental.pallas import tpu as pltpu

N_IN = 32          # sequence length ("H" in the torch NCHW view)
N_CLASSES = 10
BATCH = 4
EPS = 1e-5

K1, C1 = 7, 128
K2, C2 = 5, 256
K3, C3 = 3, 128
PAD1, PAD2, PAD3 = 3, 2, 1
PADMAX = max(PAD1, PAD2, PAD3)
NC_PAD = 128       # lane-padded logits width


def _round_up(x, m):
    return (x + m - 1) // m * m


def convnet_forward(x, kparams, n_classes=N_CLASSES):
    """x: (B, n_in) float32 -> (B, n_classes) log-probs."""
    w1, b1, w2, b2, w3, b3, w4, b4 = kparams
    B, L = x.shape
    nc_pad = w4.shape[1]

    # grid layout: NB blocks of BB samples; each block is one flat slab buffer.
    NB = 2 if (B % 2 == 0 and B >= 2) else 1
    BB = B // NB
    LP = _round_up(L + 2 * PADMAX, 8)      # per-sample slab length (rows)
    OFF = PADMAX                           # valid rows live at [OFF, OFF+L)
    TRAIL = LP - OFF - L                   # trailing pad rows per slab
    BLK_M = BB * LP                        # flat rows per grid step
    MZ1 = BLK_M - K1 + 1                   # rows computed by each tap matmul
    MZ2 = BLK_M - K2 + 1
    MZ3 = BLK_M - K3 + 1

    def kernel(x_ref, w1_ref, b1_ref, w2_ref, b2_ref, w3_ref, b3_ref,
               w4_ref, b4_ref, out_ref, h1buf, h2buf):
        # ---- conv1 (1->128, k=7, pad=3) + bn1 + relu : VPU tap multiplies ----
        # single input channel => broadcast-multiply, keep it off the MXU.
        xb = jnp.broadcast_to(x_ref[0], (BLK_M, C1))           # f32, hoisted
        w1 = w1_ref[...]
        acc1 = xb[0:MZ1, :] * w1[0:1, :]
        for j in range(1, K1):
            acc1 = acc1 + xb[j:j + MZ1, :] * w1[j:j + 1, :]
        h1 = jnp.maximum(acc1 + b1_ref[...], 0.0)              # (MZ1, 128) f32

        # stage bf16 into the flat padded buffer (shift by PAD1), then zero
        # ONLY the inter-sample pad rows (interior rows are fully overwritten).
        h1buf[PAD1:PAD1 + MZ1, :] = h1.astype(jnp.bfloat16)
        for s in range(BB):
            base = s * LP
            h1buf[base:base + OFF, :] = jnp.zeros((OFF, C1), jnp.bfloat16)
            h1buf[base + OFF + L:base + LP, :] = jnp.zeros((TRAIL, C1), jnp.bfloat16)

        # ---- conv2 (128->256, k=5, pad=2) + bn2 + relu : MXU tap matmuls ----
        # acc initialized from the j=0 tap (no zeros materialization).
        acc2 = jnp.dot(h1buf[0:MZ2, :], w2_ref[0],
                       preferred_element_type=jnp.float32)
        for j in range(1, K2):
            acc2 = acc2 + jnp.dot(h1buf[j:j + MZ2, :], w2_ref[j],
                                  preferred_element_type=jnp.float32)
        h2 = jnp.maximum(acc2 + b2_ref[...], 0.0)              # (MZ2, 256) f32

        h2buf[PAD2:PAD2 + MZ2, :] = h2.astype(jnp.bfloat16)
        for s in range(BB):
            base = s * LP
            h2buf[base:base + OFF, :] = jnp.zeros((OFF, C2), jnp.bfloat16)
            h2buf[base + OFF + L:base + LP, :] = jnp.zeros((TRAIL, C2), jnp.bfloat16)

        # ---- conv3 (256->128, k=3, pad=1) + bn3 + relu ----
        acc3 = jnp.dot(h2buf[0:MZ3, :], w3_ref[0],
                       preferred_element_type=jnp.float32)
        for j in range(1, K3):
            acc3 = acc3 + jnp.dot(h2buf[j:j + MZ3, :], w3_ref[j],
                                  preferred_element_type=jnp.float32)
        h3 = jnp.maximum(acc3 + b3_ref[...], 0.0)              # (MZ3, 128) f32

        # ---- avg_pool2d(kernel=1) is identity; torch.mean(dim=2) == mean over L
        rows = []
        for s in range(BB):
            st = s * LP + OFF - PAD3      # h3 row index of sample s, position 0
            rows.append(jnp.mean(h3[st:st + L, :], axis=0, keepdims=True))
        pooled = jnp.concatenate(rows, axis=0)                 # (BB, 128) f32

        # ---- fc4 + log_softmax over lane-padded logits (pad lanes carry -1e30
        #      bias => exp()==0, so the softmax over the real 10 classes is exact)
        logits = jnp.dot(pooled, w4_ref[...],
                         preferred_element_type=jnp.float32) + b4_ref[...]
        m = jnp.max(logits, axis=1, keepdims=True)
        z = logits - m
        lse = jnp.log(jnp.sum(jnp.exp(z), axis=1, keepdims=True))
        out_ref[0] = z - lse                                   # (BB, NC_PAD)

    # glue: zero-pad each sample to its slab and flatten NB blocks of BB slabs.
    xp = jnp.pad(x.astype(jnp.float32), ((0, 0), (OFF, LP - OFF - L)))  # (B, LP)
    x_staged = xp.reshape(NB, BLK_M, 1)

    out = pl.pallas_call(
        kernel,
        out_shape=jax.ShapeDtypeStruct((NB, BB, nc_pad), jnp.float32),
        grid_spec=pltpu.PrefetchScalarGridSpec(
            num_scalar_prefetch=0,
            grid=(NB,),
            in_specs=[
                pl.BlockSpec((1, BLK_M, 1), lambda i: (i, 0, 0)),
                pl.BlockSpec((K1, C1), lambda i: (0, 0)),
                pl.BlockSpec((1, C1), lambda i: (0, 0)),
                pl.BlockSpec((K2, C1, C2), lambda i: (0, 0, 0)),
                pl.BlockSpec((1, C2), lambda i: (0, 0)),
                pl.BlockSpec((K3, C2, C3), lambda i: (0, 0, 0)),
                pl.BlockSpec((1, C3), lambda i: (0, 0)),
                pl.BlockSpec((C3, nc_pad), lambda i: (0, 0)),
                pl.BlockSpec((1, nc_pad), lambda i: (0, 0)),
            ],
            out_specs=pl.BlockSpec((1, BB, nc_pad), lambda i: (i, 0, 0)),
            scratch_shapes=[
                pltpu.VMEM((BLK_M, C1), jnp.bfloat16),
                pltpu.VMEM((BLK_M, C2), jnp.bfloat16),
            ],
        ),
        compiler_params=pltpu.CompilerParams(dimension_semantics=("parallel",)),
    )(x_staged, w1, b1, w2, b2, w3, b3, w4, b4)
    return out.reshape(B, nc_pad)[:, :n_classes]


# ----------------------------- parameters ------------------------------------
def _conv_bn_init(key, cout, cin, k, wscale):
    kw, kb, kg, kbe, km, kv = jax.random.split(key, 6)
    return dict(
        W=wscale * jax.random.normal(kw, (cout, cin, k, 1), jnp.float32),
        b=0.1 * jax.random.normal(kb, (cout,), jnp.float32),
        gamma=1.0 + 0.1 * jax.random.normal(kg, (cout,), jnp.float32),
        beta=0.1 * jax.random.normal(kbe, (cout,), jnp.float32),
        mean=0.1 * jax.random.normal(km, (cout,), jnp.float32),
        var=jax.random.uniform(kv, (cout,), jnp.float32, 0.5, 1.5),
    )


def init_raw_params(key):
    k1, k2, k3, k4, k5 = jax.random.split(key, 5)
    return dict(
        c1=_conv_bn_init(k1, C1, 1, K1, 0.3),
        c2=_conv_bn_init(k2, C2, C1, K2, 0.05),
        c3=_conv_bn_init(k3, C3, C2, K3, 0.05),
        fc_w=0.1 * jax.random.normal(k4, (N_CLASSES, C3), jnp.float32),
        fc_b=0.1 * jax.random.normal(k5, (N_CLASSES,), jnp.float32),
    )


def _fold_conv_bn(p):
    """Fold eval-mode BN into conv weights (f32); return (K,Cin,Cout) W + (1,Cout) b."""
    s = p["gamma"] / jnp.sqrt(p["var"] + EPS)                      # (Cout,)
    wk = jnp.transpose(p["W"][:, :, :, 0], (2, 1, 0)) * s[None, None, :]
    bk = (p["b"] - p["mean"]) * s + p["beta"]
    return wk, bk.reshape(1, -1)


def to_kernel_params(raw, n_classes=N_CLASSES, nc_pad=NC_PAD):
    w1, b1 = _fold_conv_bn(raw["c1"])        # (7,1,128), (1,128)
    w2, b2 = _fold_conv_bn(raw["c2"])        # (5,128,256), (1,256)
    w3, b3 = _fold_conv_bn(raw["c3"])        # (3,256,128), (1,128)
    # fc4: lane-pad n_classes -> 128; pad logits get -1e30 bias (exp == 0).
    w4 = jnp.zeros((C3, nc_pad), jnp.float32).at[:, :n_classes].set(raw["fc_w"].T)
    b4 = jnp.full((1, nc_pad), -1e30, jnp.float32).at[0, :n_classes].set(raw["fc_b"])
    return (w1[:, 0, :].astype(jnp.float32), b1.astype(jnp.float32),   # conv1 stays f32 (VPU)
            w2.astype(jnp.bfloat16), b2.astype(jnp.float32),           # conv2 MXU operands bf16
            w3.astype(jnp.bfloat16), b3.astype(jnp.float32),           # conv3 MXU operands bf16
            w4, b4)


# --------------------- torch-semantics reference (plain JAX) -----------------
def reference_forward(x, raw):
    xi = x.reshape(-1, 1, N_IN, 1)

    def block(h, p, pad):
        y = lax.conv_general_dilated(
            h, p["W"], window_strides=(1, 1), padding=((pad, pad), (0, 0)),
            dimension_numbers=("NCHW", "OIHW", "NCHW"))
        y = y + p["b"][None, :, None, None]
        y = (y - p["mean"][None, :, None, None]) / jnp.sqrt(p["var"][None, :, None, None] + EPS)
        y = y * p["gamma"][None, :, None, None] + p["beta"][None, :, None, None]
        return jnp.maximum(y, 0.0)

    h = block(xi, raw["c1"], PAD1)
    h = block(h, raw["c2"], PAD2)
    h = block(h, raw["c3"], PAD3)
    h = jnp.mean(h, axis=2)                   # avg_pool2d(.,1) is identity; mean over dim=2
    h = h.reshape(-1, C3)
    logits = h @ raw["fc_w"].T + raw["fc_b"]
    return jax.nn.log_softmax(logits, axis=1)


if __name__ == "__main__":
    key = jax.random.PRNGKey(0)
    kx, kp = jax.random.split(key)
    x = jax.random.normal(kx, (BATCH, N_IN), jnp.float32)

    raw = init_raw_params(kp)
    kparams = to_kernel_params(raw)

    out = convnet_forward(x, kparams)
    out = jax.block_until_ready(out)

    ref = reference_forward(x, raw)
    # tolerance relaxed slightly vs pure-f32: conv2/conv3 operands are bf16.
    np.testing.assert_allclose(np.asarray(out), np.asarray(ref), atol=2e-2, rtol=2e-2)

    print("KERNEL_OK")
</pallas_src>

<mosaic_0001>
module attributes {stable_mosaic.version = 11 : i64} {
  func.func @kernel(%arg0: i32, %arg1: memref<1x80x1xf32, #tpu.memory_space<vmem>>, %arg2: memref<7x128xf32, #tpu.memory_space<vmem>>, %arg3: memref<1x128xf32, #tpu.memory_space<vmem>>, %arg4: memref<5x128x256xbf16, #tpu.memory_space<vmem>>, %arg5: memref<1x256xf32, #tpu.memory_space<vmem>>, %arg6: memref<3x256x128xbf16, #tpu.memory_space<vmem>>, %arg7: memref<1x128xf32, #tpu.memory_space<vmem>>, %arg8: memref<128x128xf32, #tpu.memory_space<vmem>>, %arg9: memref<1x128xf32, #tpu.memory_space<vmem>>, %arg10: memref<1x2x128xf32, #tpu.memory_space<vmem>>, %arg11: memref<80x128xbf16, #tpu.memory_space<vmem>>, %arg12: memref<80x256xbf16, #tpu.memory_space<vmem>>) attributes {dimension_semantics = [#tpu.dimension_semantics<parallel>], iteration_bounds = array<i64: 2>, scalar_prefetch = 0 : i64, scratch_operands = 2 : i64, tpu.core_type = #tpu.core_type<tc>, window_params = [{transform_indices = @transform_0, window_bounds = array<i64: 1, 80, 1>}, {pipeline_mode = #tpu.pipeline_mode<synchronous>, transform_indices = @transform_1, window_bounds = array<i64: 7, 128>}, {pipeline_mode = #tpu.pipeline_mode<synchronous>, transform_indices = @transform_2, window_bounds = array<i64: 1, 128>}, {pipeline_mode = #tpu.pipeline_mode<synchronous>, transform_indices = @transform_3, window_bounds = array<i64: 5, 128, 256>}, {pipeline_mode = #tpu.pipeline_mode<synchronous>, transform_indices = @transform_4, window_bounds = array<i64: 1, 256>}, {pipeline_mode = #tpu.pipeline_mode<synchronous>, transform_indices = @transform_5, window_bounds = array<i64: 3, 256, 128>}, {pipeline_mode = #tpu.pipeline_mode<synchronous>, transform_indices = @transform_6, window_bounds = array<i64: 1, 128>}, {pipeline_mode = #tpu.pipeline_mode<synchronous>, transform_indices = @transform_7, window_bounds = array<i64: 128, 128>}, {pipeline_mode = #tpu.pipeline_mode<synchronous>, transform_indices = @transform_8, window_bounds = array<i64: 1, 128>}, {transform_indices = @transform_9, window_bounds = array<i64: 1, 2, 128>}]} {
    %c0 = arith.constant 0 : index
    %c0_0 = arith.constant 0 : index
    %c0_1 = arith.constant 0 : index
    %0 = vector.load %arg1[%c0, %c0_0, %c0_1] : memref<1x80x1xf32, #tpu.memory_space<vmem>>, vector<1x80x1xf32>
    %1 = vector.shape_cast %0 : vector<1x80x1xf32> to vector<80x1xf32>
    %2 = vector.shape_cast %1 : vector<80x1xf32> to vector<80x1xf32>
    %3 = vector.broadcast %2 : vector<80x1xf32> to vector<80x128xf32>
    %c0_2 = arith.constant 0 : index
    %c0_3 = arith.constant 0 : index
    %4 = vector.load %arg2[%c0_2, %c0_3] : memref<7x128xf32, #tpu.memory_space<vmem>>, vector<7x128xf32>
    %5 = vector.extract_strided_slice %3 {offsets = [0, 0], sizes = [74, 128], strides = [1, 1]} : vector<80x128xf32> to vector<74x128xf32>
    %6 = vector.extract_strided_slice %4 {offsets = [0, 0], sizes = [1, 128], strides = [1, 1]} : vector<7x128xf32> to vector<1x128xf32>
    %7 = vector.broadcast %6 : vector<1x128xf32> to vector<74x128xf32>
    %8 = arith.mulf %5, %7 : vector<74x128xf32>
    %9 = vector.extract_strided_slice %3 {offsets = [1, 0], sizes = [74, 128], strides = [1, 1]} : vector<80x128xf32> to vector<74x128xf32>
    %10 = vector.extract_strided_slice %4 {offsets = [1, 0], sizes = [1, 128], strides = [1, 1]} : vector<7x128xf32> to vector<1x128xf32>
    %11 = vector.broadcast %10 : vector<1x128xf32> to vector<74x128xf32>
    %12 = arith.mulf %9, %11 : vector<74x128xf32>
    %13 = arith.addf %8, %12 : vector<74x128xf32>
    %14 = vector.extract_strided_slice %3 {offsets = [2, 0], sizes = [74, 128], strides = [1, 1]} : vector<80x128xf32> to vector<74x128xf32>
    %15 = vector.extract_strided_slice %4 {offsets = [2, 0], sizes = [1, 128], strides = [1, 1]} : vector<7x128xf32> to vector<1x128xf32>
    %16 = vector.broadcast %15 : vector<1x128xf32> to vector<74x128xf32>
    %17 = arith.mulf %14, %16 : vector<74x128xf32>
    %18 = arith.addf %13, %17 : vector<74x128xf32>
    %19 = vector.extract_strided_slice %3 {offsets = [3, 0], sizes = [74, 128], strides = [1, 1]} : vector<80x128xf32> to vector<74x128xf32>
    %20 = vector.extract_strided_slice %4 {offsets = [3, 0], sizes = [1, 128], strides = [1, 1]} : vector<7x128xf32> to vector<1x128xf32>
    %21 = vector.broadcast %20 : vector<1x128xf32> to vector<74x128xf32>
    %22 = arith.mulf %19, %21 : vector<74x128xf32>
    %23 = arith.addf %18, %22 : vector<74x128xf32>
    %24 = vector.extract_strided_slice %3 {offsets = [4, 0], sizes = [74, 128], strides = [1, 1]} : vector<80x128xf32> to vector<74x128xf32>
    %25 = vector.extract_strided_slice %4 {offsets = [4, 0], sizes = [1, 128], strides = [1, 1]} : vector<7x128xf32> to vector<1x128xf32>
    %26 = vector.broadcast %25 : vector<1x128xf32> to vector<74x128xf32>
    %27 = arith.mulf %24, %26 : vector<74x128xf32>
    %28 = arith.addf %23, %27 : vector<74x128xf32>
    %29 = vector.extract_strided_slice %3 {offsets = [5, 0], sizes = [74, 128], strides = [1, 1]} : vector<80x128xf32> to vector<74x128xf32>
    %30 = vector.extract_strided_slice %4 {offsets = [5, 0], sizes = [1, 128], strides = [1, 1]} : vector<7x128xf32> to vector<1x128xf32>
    %31 = vector.broadcast %30 : vector<1x128xf32> to vector<74x128xf32>
    %32 = arith.mulf %29, %31 : vector<74x128xf32>
    %33 = arith.addf %28, %32 : vector<74x128xf32>
    %34 = vector.extract_strided_slice %3 {offsets = [6, 0], sizes = [74, 128], strides = [1, 1]} : vector<80x128xf32> to vector<74x128xf32>
    %35 = vector.extract_strided_slice %4 {offsets = [6, 0], sizes = [1, 128], strides = [1, 1]} : vector<7x128xf32> to vector<1x128xf32>
    %36 = vector.broadcast %35 : vector<1x128xf32> to vector<74x128xf32>
    %37 = arith.mulf %34, %36 : vector<74x128xf32>
    %38 = arith.addf %33, %37 : vector<74x128xf32>
    %c0_4 = arith.constant 0 : index
    %c0_5 = arith.constant 0 : index
    %39 = vector.load %arg3[%c0_4, %c0_5] : memref<1x128xf32, #tpu.memory_space<vmem>>, vector<1x128xf32>
    %40 = vector.broadcast %39 : vector<1x128xf32> to vector<74x128xf32>
    %41 = arith.addf %38, %40 : vector<74x128xf32>
    %cst = arith.constant 0.000000e+00 : f32
    %42 = vector.broadcast %cst : f32 to vector<74x128xf32>
    %43 = arith.maximumf %41, %42 : vector<74x128xf32>
    %44 = arith.truncf %43 : vector<74x128xf32> to vector<74x128xbf16>
    %c3 = arith.constant 3 : index
    %c0_6 = arith.constant 0 : index
    %45 = vector.load %arg11[%c3, %c0_6] : memref<80x128xbf16, #tpu.memory_space<vmem>>, vector<74x128xbf16>
    tpu.vector_store %arg11[%c3, %c0_6], %44 {strides = array<i32>} : memref<80x128xbf16, #tpu.memory_space<vmem>>, vector<74x128xbf16>,
    %cst_7 = arith.constant 0.000000e+00 : bf16
    %46 = vector.broadcast %cst_7 : bf16 to vector<3x128xbf16>
    %c0_8 = arith.constant 0 : index
    %c0_9 = arith.constant 0 : index
    %47 = vector.load %arg11[%c0_8, %c0_9] : memref<80x128xbf16, #tpu.memory_space<vmem>>, vector<3x128xbf16>
    tpu.vector_store %arg11[%c0_8, %c0_9], %46 {strides = array<i32>} : memref<80x128xbf16, #tpu.memory_space<vmem>>, vector<3x128xbf16>,
    %cst_10 = arith.constant 0.000000e+00 : bf16
    %48 = vector.broadcast %cst_10 : bf16 to vector<5x128xbf16>
    %c35 = arith.constant 35 : index
    %c0_11 = arith.constant 0 : index
    %49 = vector.load %arg11[%c35, %c0_11] : memref<80x128xbf16, #tpu.memory_space<vmem>>, vector<5x128xbf16>
    tpu.vector_store %arg11[%c35, %c0_11], %48 {strides = array<i32>} : memref<80x128xbf16, #tpu.memory_space<vmem>>, vector<5x128xbf16>,
    %cst_12 = arith.constant 0.000000e+00 : bf16
    %50 = vector.broadcast %cst_12 : bf16 to vector<3x128xbf16>
    %c40 = arith.constant 40 : index
    %c0_13 = arith.constant 0 : index
    %51 = vector.load %arg11[%c40, %c0_13] : memref<80x128xbf16, #tpu.memory_space<vmem>>, vector<3x128xbf16>
    tpu.vector_store %arg11[%c40, %c0_13], %50 {strides = array<i32>} : memref<80x128xbf16, #tpu.memory_space<vmem>>, vector<3x128xbf16>,
    %cst_14 = arith.constant 0.000000e+00 : bf16
    %52 = vector.broadcast %cst_14 : bf16 to vector<5x128xbf16>
    %c75 = arith.constant 75 : index
    %c0_15 = arith.constant 0 : index
    %53 = vector.load %arg11[%c75, %c0_15] : memref<80x128xbf16, #tpu.memory_space<vmem>>, vector<5x128xbf16>
    tpu.vector_store %arg11[%c75, %c0_15], %52 {strides = array<i32>} : memref<80x128xbf16, #tpu.memory_space<vmem>>, vector<5x128xbf16>,
    %c0_16 = arith.constant 0 : index
    %c0_17 = arith.constant 0 : index
    %54 = vector.load %arg11[%c0_16, %c0_17] : memref<80x128xbf16, #tpu.memory_space<vmem>>, vector<76x128xbf16>
    %c0_18 = arith.constant 0 : index
    %c0_19 = arith.constant 0 : index
    %c0_20 = arith.constant 0 : index
    %55 = vector.load %arg4[%c0_18, %c0_19, %c0_20] : memref<5x128x256xbf16, #tpu.memory_space<vmem>>, vector<1x128x256xbf16>
    %56 = vector.shape_cast %55 : vector<1x128x256xbf16> to vector<128x256xbf16>
    %cst_21 = arith.constant dense<0.000000e+00> : vector<76x256xf32>
    %57 = tpu.matmul %54, %56, %cst_21 {dimension_numbers = #tpu.dot_dimension_numbers<[1], [0], [0], [1], [0, 0, 1, 1], [], []>} : vector<76x128xbf16>, vector<128x256xbf16>, vector<76x256xf32> -> vector<76x256xf32>
    %c1 = arith.constant 1 : index
    %c0_22 = arith.constant 0 : index
    %58 = vector.load %arg11[%c1, %c0_22] : memref<80x128xbf16, #tpu.memory_space<vmem>>, vector<76x128xbf16>
    %c1_23 = arith.constant 1 : index
    %c0_24 = arith.constant 0 : index
    %c0_25 = arith.constant 0 : index
    %59 = vector.load %arg4[%c1_23, %c0_24, %c0_25] : memref<5x128x256xbf16, #tpu.memory_space<vmem>>, vector<1x128x256xbf16>
    %60 = vector.shape_cast %59 : vector<1x128x256xbf16> to vector<128x256xbf16>
    %cst_26 = arith.constant dense<0.000000e+00> : vector<76x256xf32>
    %61 = tpu.matmul %58, %60, %cst_26 {dimension_numbers = #tpu.dot_dimension_numbers<[1], [0], [0], [1], [0, 0, 1, 1], [], []>} : vector<76x128xbf16>, vector<128x256xbf16>, vector<76x256xf32> -> vector<76x256xf32>
    %62 = arith.addf %57, %61 : vector<76x256xf32>
    %c2 = arith.constant 2 : index
    %c0_27 = arith.constant 0 : index
    %63 = vector.load %arg11[%c2, %c0_27] : memref<80x128xbf16, #tpu.memory_space<vmem>>, vector<76x128xbf16>
    %c2_28 = arith.constant 2 : index
    %c0_29 = arith.constant 0 : index
    %c0_30 = arith.constant 0 : index
    %64 = vector.load %arg4[%c2_28, %c0_29, %c0_30] : memref<5x128x256xbf16, #tpu.memory_space<vmem>>, vector<1x128x256xbf16>
    %65 = vector.shape_cast %64 : vector<1x128x256xbf16> to vector<128x256xbf16>
    %cst_31 = arith.constant dense<0.000000e+00> : vector<76x256xf32>
    %66 = tpu.matmul %63, %65, %cst_31 {dimension_numbers = #tpu.dot_dimension_numbers<[1], [0], [0], [1], [0, 0, 1, 1], [], []>} : vector<76x128xbf16>, vector<128x256xbf16>, vector<76x256xf32> -> vector<76x256xf32>
    %67 = arith.addf %62, %66 : vector<76x256xf32>
    %c3_32 = arith.constant 3 : index
    %c0_33 = arith.constant 0 : index
    %68 = vector.load %arg11[%c3_32, %c0_33] : memref<80x128xbf16, #tpu.memory_space<vmem>>, vector<76x128xbf16>
    %c3_34 = arith.constant 3 : index
    %c0_35 = arith.constant 0 : index
    %c0_36 = arith.constant 0 : index
    %69 = vector.load %arg4[%c3_34, %c0_35, %c0_36] : memref<5x128x256xbf16, #tpu.memory_space<vmem>>, vector<1x128x256xbf16>
    %70 = vector.shape_cast %69 : vector<1x128x256xbf16> to vector<128x256xbf16>
    %cst_37 = arith.constant dense<0.000000e+00> : vector<76x256xf32>
    %71 = tpu.matmul %68, %70, %cst_37 {dimension_numbers = #tpu.dot_dimension_numbers<[1], [0], [0], [1], [0, 0, 1, 1], [], []>} : vector<76x128xbf16>, vector<128x256xbf16>, vector<76x256xf32> -> vector<76x256xf32>
    %72 = arith.addf %67, %71 : vector<76x256xf32>
    %c4 = arith.constant 4 : index
    %c0_38 = arith.constant 0 : index
    %73 = vector.load %arg11[%c4, %c0_38] : memref<80x128xbf16, #tpu.memory_space<vmem>>, vector<76x128xbf16>
    %c4_39 = arith.constant 4 : index
    %c0_40 = arith.constant 0 : index
    %c0_41 = arith.constant 0 : index
    %74 = vector.load %arg4[%c4_39, %c0_40, %c0_41] : memref<5x128x256xbf16, #tpu.memory_space<vmem>>, vector<1x128x256xbf16>
    %75 = vector.shape_cast %74 : vector<1x128x256xbf16> to vector<128x256xbf16>
    %cst_42 = arith.constant dense<0.000000e+00> : vector<76x256xf32>
    %76 = tpu.matmul %73, %75, %cst_42 {dimension_numbers = #tpu.dot_dimension_numbers<[1], [0], [0], [1], [0, 0, 1, 1], [], []>} : vector<76x128xbf16>, vector<128x256xbf16>, vector<76x256xf32> -> vector<76x256xf32>
    %77 = arith.addf %72, %76 : vector<76x256xf32>
    %c0_43 = arith.constant 0 : index
    %c0_44 = arith.constant 0 : index
    %78 = vector.load %arg5[%c0_43, %c0_44] : memref<1x256xf32, #tpu.memory_space<vmem>>, vector<1x256xf32>
    %79 = vector.broadcast %78 : vector<1x256xf32> to vector<76x256xf32>
    %80 = arith.addf %77, %79 : vector<76x256xf32>
    %cst_45 = arith.constant 0.000000e+00 : f32
    %81 = vector.broadcast %cst_45 : f32 to vector<76x256xf32>
    %82 = arith.maximumf %80, %81 : vector<76x256xf32>
    %83 = arith.truncf %82 : vector<76x256xf32> to vector<76x256xbf16>
    %c2_46 = arith.constant 2 : index
    %c0_47 = arith.constant 0 : index
    %84 = vector.load %arg12[%c2_46, %c0_47] : memref<80x256xbf16, #tpu.memory_space<vmem>>, vector<76x256xbf16>
    tpu.vector_store %arg12[%c2_46, %c0_47], %83 {strides = array<i32>} : memref<80x256xbf16, #tpu.memory_space<vmem>>, vector<76x256xbf16>,
    %cst_48 = arith.constant 0.000000e+00 : bf16
    %85 = vector.broadcast %cst_48 : bf16 to vector<3x256xbf16>
    %c0_49 = arith.constant 0 : index
    %c0_50 = arith.constant 0 : index
    %86 = vector.load %arg12[%c0_49, %c0_50] : memref<80x256xbf16, #tpu.memory_space<vmem>>, vector<3x256xbf16>
    tpu.vector_store %arg12[%c0_49, %c0_50], %85 {strides = array<i32>} : memref<80x256xbf16, #tpu.memory_space<vmem>>, vector<3x256xbf16>,
    %cst_51 = arith.constant 0.000000e+00 : bf16
    %87 = vector.broadcast %cst_51 : bf16 to vector<5x256xbf16>
    %c35_52 = arith.constant 35 : index
    %c0_53 = arith.constant 0 : index
    %88 = vector.load %arg12[%c35_52, %c0_53] : memref<80x256xbf16, #tpu.memory_space<vmem>>, vector<5x256xbf16>
    tpu.vector_store %arg12[%c35_52, %c0_53], %87 {strides = array<i32>} : memref<80x256xbf16, #tpu.memory_space<vmem>>, vector<5x256xbf16>,
    %cst_54 = arith.constant 0.000000e+00 : bf16
    %89 = vector.broadcast %cst_54 : bf16 to vector<3x256xbf16>
    %c40_55 = arith.constant 40 : index
    %c0_56 = arith.constant 0 : index
    %90 = vector.load %arg12[%c40_55, %c0_56] : memref<80x256xbf16, #tpu.memory_space<vmem>>, vector<3x256xbf16>
    tpu.vector_store %arg12[%c40_55, %c0_56], %89 {strides = array<i32>} : memref<80x256xbf16, #tpu.memory_space<vmem>>, vector<3x256xbf16>,
    %cst_57 = arith.constant 0.000000e+00 : bf16
    %91 = vector.broadcast %cst_57 : bf16 to vector<5x256xbf16>
    %c75_58 = arith.constant 75 : index
    %c0_59 = arith.constant 0 : index
    %92 = vector.load %arg12[%c75_58, %c0_59] : memref<80x256xbf16, #tpu.memory_space<vmem>>, vector<5x256xbf16>
    tpu.vector_store %arg12[%c75_58, %c0_59], %91 {strides = array<i32>} : memref<80x256xbf16, #tpu.memory_space<vmem>>, vector<5x256xbf16>,
    %c0_60 = arith.constant 0 : index
    %c0_61 = arith.constant 0 : index
    %93 = vector.load %arg12[%c0_60, %c0_61] : memref<80x256xbf16, #tpu.memory_space<vmem>>, vector<78x256xbf16>
    %c0_62 = arith.constant 0 : index
    %c0_63 = arith.constant 0 : index
    %c0_64 = arith.constant 0 : index
    %94 = vector.load %arg6[%c0_62, %c0_63, %c0_64] : memref<3x256x128xbf16, #tpu.memory_space<vmem>>, vector<1x256x128xbf16>
    %95 = vector.shape_cast %94 : vector<1x256x128xbf16> to vector<256x128xbf16>
    %cst_65 = arith.constant dense<0.000000e+00> : vector<78x128xf32>
    %96 = tpu.matmul %93, %95, %cst_65 {dimension_numbers = #tpu.dot_dimension_numbers<[1], [0], [0], [1], [0, 0, 1, 1], [], []>} : vector<78x256xbf16>, vector<256x128xbf16>, vector<78x128xf32> -> vector<78x128xf32>
    %c1_66 = arith.constant 1 : index
    %c0_67 = arith.constant 0 : index
    %97 = vector.load %arg12[%c1_66, %c0_67] : memref<80x256xbf16, #tpu.memory_space<vmem>>, vector<78x256xbf16>
    %c1_68 = arith.constant 1 : index
    %c0_69 = arith.constant 0 : index
    %c0_70 = arith.constant 0 : index
    %98 = vector.load %arg6[%c1_68, %c0_69, %c0_70] : memref<3x256x128xbf16, #tpu.memory_space<vmem>>, vector<1x256x128xbf16>
    %99 = vector.shape_cast %98 : vector<1x256x128xbf16> to vector<256x128xbf16>
    %cst_71 = arith.constant dense<0.000000e+00> : vector<78x128xf32>
    %100 = tpu.matmul %97, %99, %cst_71 {dimension_numbers = #tpu.dot_dimension_numbers<[1], [0], [0], [1], [0, 0, 1, 1], [], []>} : vector<78x256xbf16>, vector<256x128xbf16>, vector<78x128xf32> -> vector<78x128xf32>
    %101 = arith.addf %96, %100 : vector<78x128xf32>
    %c2_72 = arith.constant 2 : index
    %c0_73 = arith.constant 0 : index
    %102 = vector.load %arg12[%c2_72, %c0_73] : memref<80x256xbf16, #tpu.memory_space<vmem>>, vector<78x256xbf16>
    %c2_74 = arith.constant 2 : index
    %c0_75 = arith.constant 0 : index
    %c0_76 = arith.constant 0 : index
    %103 = vector.load %arg6[%c2_74, %c0_75, %c0_76] : memref<3x256x128xbf16, #tpu.memory_space<vmem>>, vector<1x256x128xbf16>
    %104 = vector.shape_cast %103 : vector<1x256x128xbf16> to vector<256x128xbf16>
    %cst_77 = arith.constant dense<0.000000e+00> : vector<78x128xf32>
    %105 = tpu.matmul %102, %104, %cst_77 {dimension_numbers = #tpu.dot_dimension_numbers<[1], [0], [0], [1], [0, 0, 1, 1], [], []>} : vector<78x256xbf16>, vector<256x128xbf16>, vector<78x128xf32> -> vector<78x128xf32>
    %106 = arith.addf %101, %105 : vector<78x128xf32>
    %c0_78 = arith.constant 0 : index
    %c0_79 = arith.constant 0 : index
    %107 = vector.load %arg7[%c0_78, %c0_79] : memref<1x128xf32, #tpu.memory_space<vmem>>, vector<1x128xf32>
    %108 = vector.broadcast %107 : vector<1x128xf32> to vector<78x128xf32>
    %109 = arith.addf %106, %108 : vector<78x128xf32>
    %cst_80 = arith.constant 0.000000e+00 : f32
    %110 = vector.broadcast %cst_80 : f32 to vector<78x128xf32>
    %111 = arith.maximumf %109, %110 : vector<78x128xf32>
    %112 = vector.extract_strided_slice %111 {offsets = [2, 0], sizes = [32, 128], strides = [1, 1]} : vector<78x128xf32> to vector<32x128xf32>
    %cst_81 = arith.constant dense<0.000000e+00> : vector<128xf32>
    %113 = vector.multi_reduction <add>, %112, %cst_81 [0] : vector<32x128xf32> to vector<128xf32>
    %114 = vector.shape_cast %113 : vector<128xf32> to vector<1x128xf32>
    %cst_82 = arith.constant 3.200000e+01 : f32
    %115 = vector.broadcast %cst_82 : f32 to vector<1x128xf32>
    %116 = arith.divf %114, %115 : vector<1x128xf32>
    %117 = vector.extract_strided_slice %111 {offsets = [42, 0], sizes = [32, 128], strides = [1, 1]} : vector<78x128xf32> to vector<32x128xf32>
    %cst_83 = arith.constant dense<0.000000e+00> : vector<128xf32>
    %118 = vector.multi_reduction <add>, %117, %cst_83 [0] : vector<32x128xf32> to vector<128xf32>
    %119 = vector.shape_cast %118 : vector<128xf32> to vector<1x128xf32>
    %cst_84 = arith.constant 3.200000e+01 : f32
    %120 = vector.broadcast %cst_84 : f32 to vector<1x128xf32>
    %121 = arith.divf %119, %120 : vector<1x128xf32>
    %122 = tpu.concatenate %116, %121 in 0 : vector<1x128xf32>, vector<1x128xf32> -> vector<2x128xf32>
    %c0_85 = arith.constant 0 : index
    %c0_86 = arith.constant 0 : index
    %123 = vector.load %arg8[%c0_85, %c0_86] : memref<128x128xf32, #tpu.memory_space<vmem>>, vector<128x128xf32>
    %cst_87 = arith.constant dense<0.000000e+00> : vector<2x128xf32>
    %124 = tpu.matmul %122, %123, %cst_87 {dimension_numbers = #tpu.dot_dimension_numbers<[1], [0], [0], [1], [0, 0, 1, 1], [], []>} : vector<2x128xf32>, vector<128x128xf32>, vector<2x128xf32> -> vector<2x128xf32>
    %c0_88 = arith.constant 0 : index
    %c0_89 = arith.constant 0 : index
    %125 = vector.load %arg9[%c0_88, %c0_89] : memref<1x128xf32, #tpu.memory_space<vmem>>, vector<1x128xf32>
    %126 = vector.broadcast %125 : vector<1x128xf32> to vector<2x128xf32>
    %127 = arith.addf %124, %126 : vector<2x128xf32>
    %cst_90 = arith.constant dense<0xFF800000> : vector<2xf32>
    %128 = vector.multi_reduction <maximumf>, %127, %cst_90 [1] : vector<2x128xf32> to vector<2xf32>
    %129 = vector.shape_cast %128 : vector<2xf32> to vector<2x1xf32>
    %130 = vector.broadcast %129 : vector<2x1xf32> to vector<2x128xf32>
    %131 = arith.subf %127, %130 : vector<2x128xf32>
    %132 = math.exp %131 : vector<2x128xf32>
    %cst_91 = arith.constant dense<0.000000e+00> : vector<2xf32>
    %133 = vector.multi_reduction <add>, %132, %cst_91 [1] : vector<2x128xf32> to vector<2xf32>
    %134 = vector.shape_cast %133 : vector<2xf32> to vector<2x1xf32>
    %135 = math.log %134 : vector<2x1xf32>
    %136 = vector.broadcast %135 : vector<2x1xf32> to vector<2x128xf32>
    %137 = arith.subf %131, %136 : vector<2x128xf32>
    %c0_92 = arith.constant 0 : index
    %c0_93 = arith.constant 0 : index
    %c0_94 = arith.constant 0 : index
    %138 = vector.load %arg10[%c0_92, %c0_93, %c0_94] : memref<1x2x128xf32, #tpu.memory_space<vmem>>, vector<1x2x128xf32>
    %139 = vector.shape_cast %138 : vector<1x2x128xf32> to vector<2x128xf32>
    %140 = vector.shape_cast %137 : vector<2x128xf32> to vector<1x2x128xf32>
    tpu.vector_store %arg10[%c0_92, %c0_93, %c0_94], %140 {strides = array<i32>} : memref<1x2x128xf32, #tpu.memory_space<vmem>>, vector<1x2x128xf32>,
    return
  }
  func.func @transform_0(%arg0: i32) -> (i32, i32, i32) {
    %c0_i32 = arith.constant 0 : i32
    %c0_i32_0 = arith.constant 0 : i32
    %c0_i32_1 = arith.constant 0 : i32
    return %arg0, %c0_i32, %c0_i32_0 : i32, i32, i32
  }
  func.func @transform_1(%arg0: i32) -> (i32, i32) {
    %c0_i32 = arith.constant 0 : i32
    %c0_i32_0 = arith.constant 0 : i32
    %c0_i32_1 = arith.constant 0 : i32
    return %c0_i32, %c0_i32_0 : i32, i32
  }
  func.func @transform_2(%arg0: i32) -> (i32, i32) {
    %c0_i32 = arith.constant 0 : i32
    %c0_i32_0 = arith.constant 0 : i32
    %c0_i32_1 = arith.constant 0 : i32
    return %c0_i32, %c0_i32_0 : i32, i32
  }
  func.func @transform_3(%arg0: i32) -> (i32, i32, i32) {
    %c0_i32 = arith.constant 0 : i32
    %c0_i32_0 = arith.constant 0 : i32
    %c0_i32_1 = arith.constant 0 : i32
    %c0_i32_2 = arith.constant 0 : i32
    return %c0_i32, %c0_i32_0, %c0_i32_1 : i32, i32, i32
  }
  func.func @transform_4(%arg0: i32) -> (i32, i32) {
    %c0_i32 = arith.constant 0 : i32
    %c0_i32_0 = arith.constant 0 : i32
    %c0_i32_1 = arith.constant 0 : i32
    return %c0_i32, %c0_i32_0 : i32, i32
  }
  func.func @transform_5(%arg0: i32) -> (i32, i32, i32) {
    %c0_i32 = arith.constant 0 : i32
    %c0_i32_0 = arith.constant 0 : i32
    %c0_i32_1 = arith.constant 0 : i32
    %c0_i32_2 = arith.constant 0 : i32
    return %c0_i32, %c0_i32_0, %c0_i32_1 : i32, i32, i32
  }
  func.func @transform_6(%arg0: i32) -> (i32, i32) {
    %c0_i32 = arith.constant 0 : i32
    %c0_i32_0 = arith.constant 0 : i32
    %c0_i32_1 = arith.constant 0 : i32
    return %c0_i32, %c0_i32_0 : i32, i32
  }
  func.func @transform_7(%arg0: i32) -> (i32, i32) {
    %c0_i32 = arith.constant 0 : i32
    %c0_i32_0 = arith.constant 0 : i32
    %c0_i32_1 = arith.constant 0 : i32
    return %c0_i32, %c0_i32_0 : i32, i32
  }
  func.func @transform_8(%arg0: i32) -> (i32, i32) {
    %c0_i32 = arith.constant 0 : i32
    %c0_i32_0 = arith.constant 0 : i32
    %c0_i32_1 = arith.constant 0 : i32
    return %c0_i32, %c0_i32_0 : i32, i32
  }
  func.func @transform_9(%arg0: i32) -> (i32, i32, i32) {
    %c0_i32 = arith.constant 0 : i32
    %c0_i32_0 = arith.constant 0 : i32
    %c0_i32_1 = arith.constant 0 : i32
    return %arg0, %c0_i32, %c0_i32_0 : i32, i32, i32
  }
}

</mosaic_0001>

<bundles_post_ra>
// kernel: tpu_custom_call.1
= control target key start
LH: loop header
LB: loop body
LE: loop exit
PB: predicated region body
PF: predicated region fallthrough
CT: control target
= control target key end

     0   :  { %14 = vsyncpa [#allocation5], 0  ;;  %s5039_s0 = inlined_call_operand.vmem [shape: f32[2,80,1], index: 0, kind: input, shape index: {}]   ;;  %s5040_s1 = inlined_call_operand.vmem [shape: f32[7,128], index: 1, kind: input, shape index: {}]   ;;  %s5041_s2 = inlined_call_operand.vmem [shape: f32[1,128], index: 2, kind: input, shape index: {}]   ;;  %s5042_s3 = inlined_call_operand.hbm [shape: bf16[5,128,256], index: 3, kind: input, shape index: {}]   ;;  %s5043_s4 = inlined_call_operand.vmem [shape: f32[1,256], index: 4, kind: input, shape index: {}]   ;;  %s5044_s5 = inlined_call_operand.hbm [shape: bf16[3,256,128], index: 5, kind: input, shape index: {}]   ;;  %s5045_s6 = inlined_call_operand.vmem [shape: f32[1,128], index: 6, kind: input, shape index: {}]   ;;  %s5046_s7 = inlined_call_operand.vmem [shape: f32[128,128], index: 7, kind: input, shape index: {}]   ;;  %s5047_s8 = inlined_call_operand.vmem [shape: f32[1,128], index: 8, kind: input, shape index: {}]   ;;  %s5048_s9 = inlined_call_operand.hbm [shape: f32[2,2,128], index: 9, kind: output, shape index: {}]  }
   0x1   :  { %15 = vsyncpa [#allocation8], 0 }
   0x2   :  { %16 = vsyncpa [#allocation6], 0 }
   0x3   :  { %18 = vsyncpa [#allocation6 + $0x1], 0  ;;  %s4071_s30 = smov 0   ;;  %s4073_s10 = smov 0  }
   0x4   :  { %s4075_s11 = smov 0   ;;  %s4077_s12 = smov 0  }
   0x5 LB: > { %5055 = sst [smem:[#allocation13_spill]] %s4004_s11  ;;  %s4092_s13 = sadd.s32 4294967295, %s4008_s12   ;;  %s4008_s12 = sphi %s4077_s12, %s5081_s12   ;;  %s4004_s11 = sphi %s4075_s11, %s5083_s11   ;;  %s4000_s10 = sphi %s4073_s10, %s5085_s10   ;;  %s3996_s30 = sphi %s4071_s30, %s5084_s30  }
   0x6   : > { %s3200_s14 = sadd.s32 4294967294, %s4008_s12   ;;  %s4096_s15 = sadd.s32 1, %s4008_s12  }
   0x7   : > { %5056 = sst [smem:[#allocation14_spill]] %s4096_s15  ;;  %s225_s16 = sadd.s32 1, %s4004_s11 }
   0x8   : > { %s222_s17 = ssub.s32 %s4008_s12, %s4096_s15  ;;  %p235_p0 = scmp.ne.s32.totalorder %s4004_s11, %s4000_s10 }
   0x9   : > { %p223_p1 = scmp.eq.s32.totalorder %s222_s17, 0  ;;  %p236_p2 = scmp.eq.s32.totalorder %s4092_s13, 1 }
   0xa   : > { %p241_p3 = scmp.ne.s32.totalorder %s4000_s10, %s3996_s30  ;;  %p242_p4 = scmp.eq.s32.totalorder %s3200_s14, 1 }
   0xb   : > { %s4107_s18 = scalar_select %p223_p1, %s4004_s11, %s225_s16  }
   0xc   : > { %p4109_p5 = por %p236_p2, %p235_p0  ;;  %p4113_p6 = por %p242_p4, %p241_p3 }
   0xd   : > { %5057 = sst [smem:[#allocation15_spill]] %s4107_s18  ;;  %p3201_p7 = scmp.ge.s32.totalorder %s4008_s12, 1 }
   0xe   : > { %s5058_s19 = scalar_select %p4109_p5, 1, 0 }
   0xf   : > { %s5059_s20 = scalar_select %p4113_p6, 1, 0 }
  0x10   : > { %p249_p8 = scmp.lt.s32.totalorder %s4008_s12, 3  ;;  %p5049_p9 = scmp.eq.s32.totalorder %s4092_s13, 0 }
  0x11   : > { %s4010_s22 = smov [#allocation4]   ;;  %s4011_s25 = smov [#allocation7]  }
  0x12   : > { %p4120_p10 = pnand %p3201_p7, %p249_p8  ;;  %s267_s23 = sshll.u32 %s4010_s22, 4  ;;  %s268_s23 = int_to_ptr.vmem [resolvable:$true] %s267_s23 }
  0x13   : > { %s283_s26 = sshll.u32 %s4011_s25, 4  ;;  %s3882_s29 = scalar_lea.hbm %s5042_s3, 10240  ;;  %s4132_s26 = int_to_ptr.vmem [resolvable:$true] %s283_s26 }
  0x14   : > { %s5060_s21 = scalar_select %p4120_p10, 1, 0 }
  0x15   : > { %p3650_p11 = pneg %p4120_p10  ;;  %p3883_p13 = scmp.ne.s32.totalorder %s5042_s3, %s3882_s29 }
  0x16   : > { %p3889_p3 = scmp.lt.u32.totalorder %s3882_s29, %s5042_s3 }
  0x17   : > { %p4128_p12 = pnand %p5049_p9, %p3650_p11 }
  0x19   : > { %p3884_p0 = pneg %p4128_p12 }
  0x1b   : > { %p3885_p1 = pnand %p3884_p0, %p3883_p13 }
  0x1d   : > { %p3886_p2 = pneg %p3885_p1 }
  0x1f   : > { %p3891_p4 = pnand %p3889_p3, %p3886_p2 }
  0x21   : > { %3894 = shalt.err (!%p3891_p4)
}
  0x22   : > { %s3895_s25 = scalar_lea.vmem %s268_s23, 10240  ;;  %p3903_p9 = scmp.lt.s32.totalorder %s268_s23, %s268_s23 }
  0x23   : > { %p3896_p7 = scmp.ne.s32.totalorder %s268_s23, %s3895_s25  ;;  %p3904_p6 = scmp.lt.s32.totalorder %s3895_s25, %s3895_s25 }
  0x25   : > { %p3898_p8 = pnand %p3896_p7, %p3884_p0  ;;  %p3905_p5 = por %p3904_p6, %p3903_p9 }
  0x27   : > { %p3899_p11 = pneg %p3898_p8 }
  0x29   : > { %p3906_p10 = pnand %p3905_p5, %p3899_p11 }
  0x2b   : > { %3909 = shalt.err (!%p3906_p10)
}
  0x2c   : > { %s4012_s27 = smov 128   ;;  %s4013_s28 = smov 8  }
  0x2d   : > { %3653 = dma.hbm_to_vmem [thread:$0]  (!%p4128_p12), %s5042_s3, 10240, %s268_s23, [#allocation5], %s4012_s27, %s4012_s27, %s4013_s28  }
  0x2e   : > { %s3910_s22 = scalar_lea.hbm %s5044_s5, 6144 }
  0x2f   : > { %p3911_p13 = scmp.ne.s32.totalorder %s5044_s5, %s3910_s22  ;;  %p3917_p9 = scmp.lt.u32.totalorder %s3910_s22, %s5044_s5 }
  0x31   : > { %p3913_p5 = pnand %p3911_p13, %p3884_p0 }
  0x33   : > { %p3914_p6 = pneg %p3913_p5 }
  0x35   : > { %p3919_p10 = pnand %p3917_p9, %p3914_p6 }
  0x37   : > { %3922 = shalt.err (!%p3919_p10)
}
  0x38   : > { %s3923_s23 = scalar_lea.vmem %s4132_s26, 6144  ;;  %p3931_p4 = scmp.lt.s32.totalorder %s4132_s26, %s4132_s26 }
  0x39   : > { %p3924_p1 = scmp.ne.s32.totalorder %s4132_s26, %s3923_s23  ;;  %p3932_p7 = scmp.lt.s32.totalorder %s3923_s23, %s3923_s23 }
  0x3b   : > { %p3926_p2 = pnand %p3924_p1, %p3884_p0  ;;  %p3933_p8 = por %p3932_p7, %p3931_p4 }
  0x3d   : > { %p3927_p3 = pneg %p3926_p2 }
  0x3f   : > { %p3934_p11 = pnand %p3933_p8, %p3927_p3 }
  0x41   : > { %3937 = shalt.err (!%p3934_p11)
}
  0x42   : > { %s4014_s11 = smov 64   ;;  %s4015_s15 = smov 4  }
  0x43   : > { %3656 = dma.hbm_to_vmem [thread:$0]  (!%p4128_p12), %s5044_s5, 6144, %s4132_s26, [#allocation8], %s4014_s11, %s4014_s11, %s4015_s15  }
  0x44   : > { %p5062_p13 = scmp.ne.s32.totalorder %s5060_s21, 0 }
  0x45   : > { %p5063_p0 = scmp.eq.s32.totalorder (!%p5062_p13), %s4092_s13, 0 }
  0x46   : > { %316 = sbr.rel (%p5062_p13) target bundleno = 1569 (0x621), region = 56 }
  0x4d   : > { %3983 = dma.done.wait (%p5063_p0), [#allocation5], 10240   ;;  %p5064_p5 = pmov %p5063_p0 }
  0x4e   : > { %p5065_p6 = pmov %p5063_p0 }
  0x4f   : > { %3985 = vsyncadd (%p5064_p5), [#allocation5], 4294957056 }
  0x50   : > { %3987 = dma.done.wait (%p5065_p6), [#allocation8], 6144   ;;  %p5066_p9 = pmov %p5063_p0 }
  0x51   : > { %p356_p10 = scmp.lt.s32.totalorder %s4092_s13, 1  ;;  %v4016_v0 = vmov 0   ;;  %v3710_v11 = vld [vmem:[#allocation4 + $0x4] ss:$8 sps:$4 sm:$0xff]   ;;  %v3712_v12 = vld [vmem:[#allocation4] ss:$8 sps:$4 sm:$0xff]   ;;  %v423_v44 = vlaneseq }
  0x52   : > { %3989 = vsyncadd (%p5066_p9), [#allocation8], 4294961152  ;;  %3709 = vset.pattern.permute.xlu1 %v4016_v0  ;;  %3708 = vset.pattern.permute.xlu0 %v4016_v0  ;;  %v3713_v13 = vld [vmem:[#allocation4 + $0x14] ss:$8 sps:$4 sm:$0xff]   ;;  %v3715_v14 = vld [vmem:[#allocation4 + $0x10] ss:$8 sps:$4 sm:$0xff]  }
  0x53   : > { %s357_s21 = scalar_select %p356_p10, %s4092_s13, 1  ;;  %1299 = vmatprep.mubr.bf16.mxu0 %v4016_v0  ;;  %1136 = vmatprep.mubr.bf16.mxu1 %v4016_v0  ;;  %v3716_v15 = vld [vmem:[#allocation4 + $0x84] ss:$8 sps:$4 sm:$0xff]   ;;  %v3720_v17 = vld [vmem:[#allocation4 + $0x80] ss:$8 sps:$4 sm:$0xff]   ;;  %v4200_v45 = vshrl.u32 %v423_v44, 7 }
  0x54   : > { %1267 = vmatprep.subr.bf16.mxu0 %v3710_v11  ;;  %v3718_v16 = vld [vmem:[#allocation4 + $0x24] ss:$8 sps:$4 sm:$0xff]   ;;  %1104 = vmatprep.subr.bf16.mxu1 %v3716_v15  ;;  %v3721_v18 = vld [vmem:[#allocation4 + $0x20] ss:$8 sps:$4 sm:$0xff]   ;;  %v3722_v19 = vld [vmem:[#allocation4 + $0x94] ss:$8 sps:$4 sm:$0xff]  }
  0x55   : > { %s3639_s24 = smul.u32 80, %s357_s21  ;;  %1268 = vmatpush1.bf16.msra.mxu0 %v3712_v12  ;;  %1105 = vmatpush1.bf16.msra.mxu1 %v3720_v17  ;;  %v3724_v20 = vld [vmem:[#allocation4 + $0x34] ss:$8 sps:$4 sm:$0xff]   ;;  %v3726_v21 = vld [vmem:[#allocation4 + $0x90] ss:$8 sps:$4 sm:$0xff]   ;;  %v439_v46 = vsub.s32 1, %v4200_v45 }
  0x56   : > { %1269 = vmatprep.subr.bf16.mxu0 %v3713_v13  ;;  %1106 = vmatprep.subr.bf16.mxu1 %v3722_v19  ;;  %v3727_v22 = vld [vmem:[#allocation4 + $0x30] ss:$8 sps:$4 sm:$0xff]   ;;  %v3728_v23 = vld [vmem:[#allocation4 + $0xa4] ss:$8 sps:$4 sm:$0xff]   ;;  %v3732_v25 = vld [vmem:[#allocation4 + $0xa0] ss:$8 sps:$4 sm:$0xff]  }
  0x57   : > { %s360_s29 = scalar_lea.vmem %s5039_s0, %s3639_s24  ;;  %v3730_v24 = vld [vmem:[#allocation4 + $0x44] ss:$8 sps:$4 sm:$0xff]   ;;  %v3733_v26 = vld [vmem:[#allocation4 + $0x40] ss:$8 sps:$4 sm:$0xff]   ;;  %v3734_v27 = vld [vmem:[#allocation4 + $0xb4] ss:$8 sps:$4 sm:$0xff]  }
  0x58   : > { %v364_v1 = vld [vmem:[%s360_s29 + $0x10] sm:$0xff]  ;;  %v362_v2 = vld [vmem:[%s360_s29] sm:$0xff]  ;;  %v365_v3 = vld [vmem:[%s360_s29 + $0x18] sm:$0xff]  ;;  %v503_v47 = vsub.s32 2, %v4200_v45  ;;  %v567_v48 = vsub.s32 3, %v4200_v45  ;;  %v425_v50 = vsub.s32 0, %v4200_v45 }
  0x59   : > { %385 = vperm.xlu1 %3709, %v364_v1   ;;  %375 = vperm.xlu0 %3708, %v362_v2   ;;  %v363_v4 = vld [vmem:[%s360_s29 + $0x8] sm:$0xff]  ;;  %v366_v6 = vld [vmem:[%s360_s29 + $0x20] sm:$0xff]  ;;  %v369_v7 = vld [vmem:[%s360_s29 + $0x38] sm:$0xff]  ;;  %v631_v51 = vsub.s32 4, %v4200_v45  ;;  %v695_v52 = vsub.s32 5, %v4200_v45  ;;  %v759_v53 = vsub.s32 6, %v4200_v45 }
  0x5a   : > { %v367_v5 = vld [vmem:[%s360_s29 + $0x28] sm:$0xff]  ;;  %v368_v8 = vld [vmem:[%s360_s29 + $0x30] sm:$0xff]  ;;  %v370_v10 = vld [vmem:[%s360_s29 + $0x40] sm:$0xff]  ;;  %1270 = vmatpush1.bf16.msra.mxu0 %v3715_v14  ;;  %1107 = vmatpush1.bf16.msra.mxu1 %v3726_v21  ;;  %vm461_vm0 = vcmask 1046528   ;;  %vm525_vm1 = vcmask 1045504   ;;  %vm589_vm2 = vcmask 1044480  }
  0x5b   : > { %v371_v9 = vld [vmem:[%s360_s29 + $0x48] sm:$0xff]  ;;  %1271 = vmatprep.subr.bf16.mxu0 %v3718_v16  ;;  %1108 = vmatprep.subr.bf16.mxu1 %v3728_v23  ;;  %v3736_v28 = vld [vmem:[#allocation4 + $0x54] ss:$8 sps:$4 sm:$0xff]   ;;  %v3738_v29 = vld [vmem:[#allocation4 + $0xb0] ss:$8 sps:$4 sm:$0xff]   ;;  %vm653_vm3 = vcmask 1043456  }
  0x5c   : > { %v3739_v30 = vld [vmem:[#allocation4 + $0x50] ss:$8 sps:$4 sm:$0xff]   ;;  %v3740_v31 = vld [vmem:[#allocation4 + $0xc4] ss:$8 sps:$4 sm:$0xff]   ;;  %v3744_v33 = vld [vmem:[#allocation4 + $0xc0] ss:$8 sps:$4 sm:$0xff]  }
  0x5d   : > { %390 = vperm.xlu1 %3709, %v365_v3   ;;  %380 = vperm.xlu0 %3708, %v363_v4   ;;  %v3742_v32 = vld [vmem:[#allocation4 + $0x64] ss:$8 sps:$4 sm:$0xff]   ;;  %v3745_v34 = vld [vmem:[#allocation4 + $0x60] ss:$8 sps:$4 sm:$0xff]   ;;  %v3746_v35 = vld [vmem:[#allocation4 + $0xd4] ss:$8 sps:$4 sm:$0xff]  }
  0x5e   : > { %1272 = vmatpush1.bf16.msra.mxu0 %v3721_v18  ;;  %1109 = vmatpush1.bf16.msra.mxu1 %v3732_v25  ;;  %v3748_v36 = vld [vmem:[#allocation4 + $0x74] ss:$8 sps:$4 sm:$0xff]   ;;  %v3750_v37 = vld [vmem:[#allocation4 + $0xd0] ss:$8 sps:$4 sm:$0xff]   ;;  %v3752_v39 = vld [vmem:[#allocation4 + $0xe4] ss:$8 sps:$4 sm:$0xff]  }
  0x5f   : > { %1273 = vmatprep.subr.bf16.mxu0 %v3724_v20  ;;  %1110 = vmatprep.subr.bf16.mxu1 %v3734_v27  ;;  %v3751_v38 = vld [vmem:[#allocation4 + $0x70] ss:$8 sps:$4 sm:$0xff]   ;;  %v3756_v40 = vld [vmem:[#allocation4 + $0x104] ss:$8 sps:$4 sm:$0xff]   ;;  %v3757_v41 = vld [vmem:[#allocation4 + $0xe0] ss:$8 sps:$4 sm:$0xff]  }
  0x60   : > { %v3758_v42 = vld [vmem:[#allocation4 + $0xf4] ss:$8 sps:$4 sm:$0xff]   ;;  %v3760_v43 = vld [vmem:[#allocation4 + $0xf0] ss:$8 sps:$4 sm:$0xff]   ;;  %vm717_vm4 = vcmask 1042432   ;;  %vm781_vm5 = vcmask 1041408  }
  0x61   : > { %400 = vperm.xlu1 %3709, %v367_v5   ;;  %395 = vperm.xlu0 %3708, %v366_v6   ;;  %v372_v49 = vld [vmem:[%s5040_s1] sm:$0x7f]  ;;  %vm903_vm6 = vcmask 1047553   ;;  %vm904_vm7 = vsmask.f32 7942  ;;  %vm923_vm11 = vcmask 1043457  }
  0x62   : > { %1274 = vmatpush1.bf16.msra.mxu0 %v3727_v22  ;;  %1111 = vmatpush1.bf16.msra.mxu1 %v3738_v29  ;;  %v4214_v54 = vrot.slane %v372_v49, %v439_v46  ;;  %v4216_v55 = vrot.slane %v372_v49, %v503_v47  ;;  %v4218_v56 = vrot.slane %v372_v49, %v567_v48  ;;  %vm4415_vm8 = vmand %vm903_vm6, %vm904_vm7  ;;  %vm853_vm9 = vsmask.f32 1280  ;;  %s353_s26 = sand.u32 1, %s4000_s10   ;;  %s3342_s29 = sshll.u32 %s4092_s13, 5 }
  0x63   : > { %1275 = vmatprep.subr.bf16.mxu0 %v3730_v24  ;;  %1112 = vmatprep.subr.bf16.mxu1 %v3740_v31  ;;  %v4222_v57 = vrot.slane %v372_v49, %v425_v50  ;;  %v4224_v58 = vrot.slane %v372_v49, %v631_v51  ;;  %v4226_v59 = vrot.slane %v372_v49, %v695_v52  ;;  %vm4551_vm10 = vmand %vm781_vm5, %vm853_vm9  ;;  %vm928_vm12 = vcmask 1045508   ;;  %s3208_s28 = sshll.u32 %s353_s26, 1  ;;  %s4997_s25 = scalar_lea.hbm %s5048_s9, %s3342_s29 }
  0x64   : > { %v4228_v60 = vrot.slane %v372_v49, %v759_v53  ;;  %vm929_vm13 = vsmask.f32 5376  ;;  %vm4580_vm14 = vmand %vm923_vm11, %vm904_vm7  ;;  %vm934_vm6 = vcmask 1047557   ;;  %vm935_vm7 = vsmask.f32 7958  ;;  %s355_s14 = scalar_lea.vmem [#allocation9], %s3208_s28 }
  0x65   : > { %410 = vperm.xlu1 %3709, %v369_v7   ;;  %405 = vperm.xlu0 %3708, %v368_v8   ;;  %vm4585_vm15 = vmand %vm928_vm12, %vm929_vm13  ;;  %s3119_s16 = sshll.u32 %s355_s14, 4  ;;  %s3106_s23 = scalar_lea.sflag [#allocation6], %s353_s26  ;;  %s4999_s16 = int_to_ptr.vmem [resolvable:$true] %s3119_s16 }
  0x66   : > { %1276 = vmatpush1.bf16.msra.mxu0 %v3733_v26  ;;  %1113 = vmatpush1.bf16.msra.mxu1 %v3744_v33  ;;  %s3938_s11 = scalar_lea.vmem %s4999_s16, 32  ;;  %p5079_p1 = scmp.ne.s32.totalorder %s5058_s19, 0 }
  0x67   : > { %1277 = vmatprep.subr.bf16.mxu0 %v3736_v28  ;;  %1114 = vmatprep.subr.bf16.mxu1 %v3746_v35  ;;  %p3939_p12 = scmp.ne.s32.totalorder %s4999_s16, %s3938_s11  ;;  %s4020_s13 = smov [#allocation9]  }
  0x68   : > { %s3942_s15 = sshll.u32 %s4020_s13, 4  ;;  %s3943_s15 = int_to_ptr.vmem [resolvable:$false] %s3942_s15 }
  0x69   : > { %420 = vperm.xlu1 %3709, %v371_v9   ;;  %415 = vperm.xlu0 %3708, %v370_v10   ;;  %p3940_p2 = pnand %p3939_p12, %p5079_p1  ;;  %s3944_s18 = scalar_lea.vmem %s3943_s15, 64 }
  0x6a   : > { %1278 = vmatpush1.bf16.msra.mxu0 %v3739_v30  ;;  %1115 = vmatpush1.bf16.msra.mxu1 %v3750_v37  ;;  %p3945_p4 = scmp.lt.s32.totalorder %s4999_s16, %s3943_s15  ;;  %p3946_p7 = scmp.lt.s32.totalorder %s3944_s18, %s3938_s11 }
  0x6b   : > { %1279 = vmatprep.subr.bf16.mxu0 %v3742_v32  ;;  %1116 = vmatprep.subr.bf16.mxu1 %v3752_v39  ;;  %p3941_p3 = pneg %p3940_p2 }
  0x6c   : > { %p3947_p8 = por %p3946_p7, %p3945_p4 }
  0x6e   : > { %1280 = vmatpush1.bf16.msra.mxu0 %v3745_v34  ;;  %1117 = vmatpush1.bf16.msra.mxu1 %v3757_v41  ;;  %p3948_p11 = pnand %p3947_p8, %p3941_p3 }
  0x6f   : > { %1281 = vmatprep.subr.bf16.mxu0 %v3748_v36  ;;  %1118 = vmatprep.subr.bf16.mxu1 %v3758_v42 }
  0x72   : > { %1282 = vmatpush1.bf16.msra.mxu0 %v3751_v38  ;;  %1119 = vmatpush1.bf16.msra.mxu1 %v3760_v43 }
  0x73   : > { %1467 = vmatprep.subr.bf16.mxu0 %v3756_v40 }
  0xd8   : > { %v386_v61 = vpop.permute.xlu1 %385  ;;  %v376_v62 = vpop.permute.xlu0 %375 }
  0xd9   : > { %v443_v63 = vmul.f32 %v4214_v54, %v386_v61  ;;  %v4232_v1 = vmul.f32 %v4216_v55, %v386_v61  ;;  %v4235_v2 = vmul.f32 %v4218_v56, %v386_v61  ;;  %v4238_v3 = vmul.f32 %v4224_v58, %v386_v61 }
  0xda   : > { %v4241_v4 = vmul.f32 %v4226_v59, %v386_v61  ;;  %v4244_v5 = vmul.f32 %v4228_v60, %v386_v61  ;;  %v429_v6 = vmul.f32 %v4222_v57, %v386_v61  ;;  %v441_v7 = vmul.f32 %v4214_v54, %v376_v62 }
  0xdb   : > { %v465_v8 = vrot.slane %v443_v63, 1  ;;  %v529_v9 = vrot.slane %v4232_v1, 2  ;;  %v427_v10 = vmul.f32 %v4222_v57, %v376_v62  ;;  %v505_v11 = vmul.f32 %v4216_v55, %v376_v62 }
  0xdc   : > { %v4251_v12 = vpop.permute.xlu1 %390  ;;  %v593_v13 = vrot.slane %v4235_v2, 3  ;;  %v657_v14 = vrot.slane %v4238_v3, 4  ;;  %v569_v15 = vmul.f32 %v4218_v56, %v376_v62  ;;  %v4257_v16 = vmul.f32 %v4224_v58, %v376_v62  ;;  %v381_v25 = vpop.permute.xlu0 %380 }
  0xdd   : > { %v721_v17 = vrot.slane %v4241_v4, 5  ;;  %v785_v18 = vrot.slane %v4244_v5, 6  ;;  %v462_v19 = vrot.slane %v441_v7, 1  ;;  %v4263_v20 = vmul.f32 %v4214_v54, %v4251_v12 }
  0xde   : > { %v526_v21 = vrot.slane %v505_v11, 2  ;;  %v4266_v22 = vmul.f32 %v4226_v59, %v376_v62  ;;  %v4269_v23 = vmul.f32 %v4228_v60, %v376_v62  ;;  %v4273_v24 = vmul.f32 %v4216_v55, %v4251_v12 }
  0xdf   : > { %v590_v26 = vrot.slane %v569_v15, 3  ;;  %v467_v27 = vrot.slane %v4263_v20, 1  ;;  %v4278_v28 = vmul.f32 %v4218_v56, %v4251_v12  ;;  %v4282_v29 = vmul.f32 %v4224_v58, %v4251_v12 }
  0xe0   : > { %v654_v30 = vrot.slane %v4257_v16, 4  ;;  %v531_v31 = vrot.slane %v4273_v24, 2  ;;  %v4288_v32 = vmul.f32 %v4226_v59, %v4251_v12  ;;  %v4292_v33 = vmul.f32 %v4228_v60, %v4251_v12 }
  0xe1   : > { %v468_v34 = vsel %vm461_vm0, %v465_v8, %v467_v27  ;;  %v595_v35 = vrot.slane %v4278_v28, 3  ;;  %v659_v36 = vrot.slane %v4282_v29, 4  ;;  %v442_v37 = vmul.f32 %v4214_v54, %v381_v25 }
  0xe2   : > { %v718_v38 = vrot.slane %v4266_v22, 5  ;;  %v493_v39 = vadd.f32 %v468_v34, %v429_v6  ;;  %v532_v40 = vsel %vm525_vm1, %v529_v9, %v531_v31  ;;  %v428_v41 = vmul.f32 %v4222_v57, %v381_v25 }
  0xe3   : > { %v723_v42 = vrot.slane %v4288_v32, 5  ;;  %v787_v43 = vrot.slane %v4292_v33, 6  ;;  %v463_v44 = vrot.slane %v442_v37, 1  ;;  %v506_v47 = vmul.f32 %v4216_v55, %v381_v25 }
  0xe4   : > { %v557_v48 = vadd.f32 %v532_v40, %v493_v39  ;;  %v596_v49 = vsel %vm589_vm2, %v593_v13, %v595_v35  ;;  %v660_v51 = vsel %vm653_vm3, %v657_v14, %v659_v36  ;;  %v570_v52 = vmul.f32 %v4218_v56, %v381_v25 }
  0xe5   : > { %v464_v53 = vsel %vm461_vm0, %v462_v19, %v463_v44  ;;  %v466_v61 = vsel %vm461_vm0, %v463_v44, %v465_v8  ;;  %v527_v62 = vrot.slane %v506_v47, 2  ;;  %v634_v63 = vmul.f32 %v4224_v58, %v381_v25  ;;  %v401_v8 = vpop.permute.xlu1 %400 }
  0xe6   : > { %v621_v1 = vadd.f32 %v596_v49, %v557_v48  ;;  %v491_v2 = vadd.f32 %v464_v53, %v427_v10  ;;  %v492_v6 = vadd.f32 %v466_v61, %v428_v41  ;;  %v591_v7 = vrot.slane %v570_v52, 3 }
  0xe7   : > { %v528_v11 = vsel %vm525_vm1, %v526_v21, %v527_v62  ;;  %v530_v15 = vsel %vm525_vm1, %v527_v62, %v529_v9  ;;  %v655_v16 = vrot.slane %v634_v63, 4  ;;  %v698_v22 = vmul.f32 %v4226_v59, %v381_v25 }
  0xe8   : > { %v782_v34 = vrot.slane %v4269_v23, 6  ;;  %v685_v37 = vadd.f32 %v660_v51, %v621_v1  ;;  %v555_v19 = vadd.f32 %v528_v11, %v491_v2  ;;  %v556_v39 = vadd.f32 %v530_v15, %v492_v6  ;;  %v396_v6 = vpop.permute.xlu0 %395 }
  0xe9   : > { %v724_v10 = vsel %vm717_vm4, %v721_v17, %v723_v42  ;;  %v592_v40 = vsel %vm589_vm2, %v590_v26, %v591_v7  ;;  %v594_v21 = vsel %vm589_vm2, %v591_v7, %v593_v13  ;;  %v719_v9 = vrot.slane %v698_v22, 5 }
  0xea   : > { %v749_v41 = vadd.f32 %v724_v10, %v685_v37  ;;  %v619_v44 = vadd.f32 %v592_v40, %v555_v19  ;;  %v620_v47 = vadd.f32 %v594_v21, %v556_v39  ;;  %v762_v23 = vmul.f32 %v4228_v60, %v381_v25  ;;  %v4347_v25 = vld [vmem:[%s5041_s2] ss:$0 sm:$0xff] }
  0xeb   : > { %v788_v48 = vsel %vm781_vm5, %v785_v18, %v787_v43  ;;  %v656_v49 = vsel %vm653_vm3, %v654_v30, %v655_v16  ;;  %v658_v26 = vsel %vm653_vm3, %v655_v16, %v657_v14  ;;  %v4342_v13 = vmul.f32 %v4214_v54, %v401_v8 }
  0xec   : > { %v813_v51 = vadd.f32 %v788_v48, %v749_v41  ;;  %v683_v52 = vadd.f32 %v656_v49, %v619_v44  ;;  %v684_v53 = vadd.f32 %v658_v26, %v620_v47  ;;  %v783_v61 = vrot.slane %v762_v23, 6 }
  0xed   : > { %v720_v62 = vsel %vm717_vm4, %v718_v38, %v719_v9  ;;  %v722_v3 = vsel %vm717_vm4, %v719_v9, %v721_v17  ;;  %v4354_v14 = vmul.f32 %v4216_v55, %v401_v8  ;;  %v4357_v30 = vmul.f32 %v4218_v56, %v401_v8 }
  0xee   : > { %v430_v63 = vmul.f32 %v4222_v57, %v4251_v12  ;;  %v747_v1 = vadd.f32 %v720_v62, %v683_v52  ;;  %v748_v2 = vadd.f32 %v722_v3, %v684_v53  ;;  %v784_v7 = vsel %vm781_vm5, %v782_v34, %v783_v61 }
  0xef   : > { %v786_v4 = vsel %vm781_vm5, %v783_v61, %v785_v18  ;;  %v4366_v17 = vmul.f32 %v4222_v57, %v401_v8  ;;  %v4369_v38 = vmul.f32 %v4224_v58, %v401_v8  ;;  %v4372_v11 = vadd.f32 %v4347_v25, %v813_v51 }
  0xf0   : > { %v811_v12 = vadd.f32 %v784_v7, %v747_v1  ;;  %v812_v15 = vadd.f32 %v786_v4, %v748_v2  ;;  %v471_v16 = vrot.slane %v4342_v13, 1  ;;  %v535_v22 = vrot.slane %v4354_v14, 2 }
  0xf1   : > { %v599_v5 = vrot.slane %v4357_v30, 3  ;;  %v445_v18 = vmul.f32 %v4214_v54, %v396_v6  ;;  %v509_v34 = vmul.f32 %v4216_v55, %v396_v6  ;;  %v4382_v39 = vmul.f32 %v4226_v59, %v401_v8 }
  0xf2   : > { %v828_v37 = vadd.f32 %v4347_v25, %v811_v12  ;;  %v829_v19 = vadd.f32 %v4347_v25, %v812_v15  ;;  %v573_v10 = vmul.f32 %v4218_v56, %v396_v6  ;;  %v663_v40 = vrot.slane %v4369_v38, 4  ;;  %v411_v15 = vpop.permute.xlu1 %410 }
  0xf3   : > { %v469_v21 = vrot.slane %v445_v18, 1  ;;  %v533_v9 = vrot.slane %v509_v34, 2  ;;  %v637_v41 = vmul.f32 %v4224_v58, %v396_v6  ;;  %v4388_v23 = vmul.f32 %v4228_v60, %v401_v8 }
  0xf4   : > { %v838_v44 = vmax.f32 %v828_v37, 0.0  ;;  %v839_v47 = vmax.f32 %v829_v19, 0.0  ;;  %v431_v48 = vmul.f32 %v4222_v57, %v396_v6  ;;  %v597_v51 = vrot.slane %v573_v10, 3 }
  0xf5   : > { %v470_v49 = vsel %vm461_vm0, %v467_v27, %v469_v21  ;;  %v472_v26 = vsel %vm461_vm0, %v469_v21, %v471_v16  ;;  %v701_v52 = vmul.f32 %v4226_v59, %v396_v6  ;;  %v727_v61 = vrot.slane %v4382_v39, 5  ;;  %v906_v21 = vld [vmem:[#allocation2] sm:$0xfe] }
  0xf6   : > { %v848_v53 = vpack.c.bf16 %v839_v47, %v838_v44  ;;  %v494_v62 = vadd.f32 %v470_v49, %v430_v63  ;;  %v495_v3 = vadd.f32 %v472_v26, %v431_v48  ;;  %v534_v8 = vsel %vm525_vm1, %v531_v31, %v533_v9 }
  0xf7   : > { %v536_v20 = vsel %vm525_vm1, %v533_v9, %v535_v22  ;;  %v661_v27 = vrot.slane %v637_v41, 4  ;;  %v765_v1 = vmul.f32 %v4228_v60, %v396_v6  ;;  %v791_v18 = vrot.slane %v4388_v23, 6 }
  0xf8   : > { %v855_v2 = vshrl.u32 %v848_v53, 16  ;;  %v858_v7 = vshll.u32 %v848_v53, 16  ;;  %v558_v4 = vadd.f32 %v534_v8, %v494_v62  ;;  %v559_v12 = vadd.f32 %v536_v20, %v495_v3 }
  0xf9   : > { %v598_v24 = vsel %vm589_vm2, %v595_v35, %v597_v51  ;;  %v600_v31 = vsel %vm589_vm2, %v597_v51, %v599_v5  ;;  %v725_v63 = vrot.slane %v701_v52, 5  ;;  %v662_v28 = vsel %vm653_vm3, %v659_v36, %v661_v27  ;;  %v406_v52 = vpop.permute.xlu0 %405 }
  0xfa   : > { %v857_v34 = vrot.slane %v855_v2, 6  ;;  %v860_v37 = vrot.slane %v858_v7, 7  ;;  %v622_v19 = vadd.f32 %v598_v24, %v558_v4  ;;  %v623_v6 = vadd.f32 %v600_v31, %v559_v12 }
  0xfb   : > { %v664_v35 = vsel %vm653_vm3, %v661_v27, %v663_v40  ;;  %v789_v9 = vrot.slane %v765_v1, 6  ;;  %v4426_v41 = vmul.f32 %v4214_v54, %v411_v15  ;;  %v4431_v49 = vmul.f32 %v4216_v55, %v411_v15 }
  0xfc   : > { %v4428_v44 = vor.u32 %v860_v37, %v857_v34  ;;  %v686_v47 = vadd.f32 %v662_v28, %v622_v19  ;;  %v687_v48 = vadd.f32 %v664_v35, %v623_v6  ;;  %v840_v26 = vmax.f32 %v4372_v11, 0.0 }
  0xfd   : > { %v726_v29 = vsel %vm717_vm4, %v723_v42, %v725_v63  ;;  %v728_v36 = vsel %vm717_vm4, %v725_v63, %v727_v61  ;;  %v4441_v51 = vmul.f32 %v4218_v56, %v411_v15  ;;  %v790_v11 = vsel %vm781_vm5, %v787_v43, %v789_v9 }
  0xfe   : > { %v907_v53 = vsel %vm4415_vm8, %v4428_v44, %v906_v21  ;;  %v750_v62 = vadd.f32 %v726_v29, %v686_v47  ;;  %v4450_v32 = vmul.f32 %v4222_v57, %v411_v15  ;;  %v751_v42 = vadd.f32 %v728_v36, %v687_v48  ;;  %vm4634_vm8 = vmand %vm934_vm6, %vm935_vm7 }
  0xff   : > { %908 = vst [vmem:[#allocation2] sm:$0xfe] %v907_v53  ;;  %v792_v3 = vsel %vm781_vm5, %v789_v9, %v791_v18  ;;  %v475_v8 = vrot.slane %v4426_v41, 1  ;;  %v4457_v20 = vmul.f32 %v4224_v58, %v411_v15  ;;  %v539_v1 = vrot.slane %v4431_v49, 2 }
 0x100   : > { %v814_v27 = vadd.f32 %v790_v11, %v750_v62  ;;  %v447_v33 = vmul.f32 %v4214_v54, %v406_v52  ;;  %v511_v43 = vmul.f32 %v4216_v55, %v406_v52  ;;  %v603_v2 = vrot.slane %v4441_v51, 3 }
 0x101   : > { %v4464_v7 = vmul.f32 %v4226_v59, %v411_v15  ;;  %v4467_v4 = vmul.f32 %v4228_v60, %v411_v15  ;;  %v575_v12 = vmul.f32 %v4218_v56, %v406_v52  ;;  %v433_v31 = vmul.f32 %v4222_v57, %v406_v52 }
 0x102   : > { %v831_v24 = vadd.f32 %v4347_v25, %v814_v27  ;;  %v473_v63 = vrot.slane %v447_v33, 1  ;;  %v537_v34 = vrot.slane %v511_v43, 2  ;;  %v815_v37 = vadd.f32 %v792_v3, %v751_v42 }
 0x103   : > { %v667_v19 = vrot.slane %v4457_v20, 4  ;;  %v639_v6 = vmul.f32 %v4224_v58, %v406_v52  ;;  %v703_v10 = vmul.f32 %v4226_v59, %v406_v52  ;;  %v601_v35 = vrot.slane %v575_v12, 3 }
 0x104   : > { %v841_v21 = vmax.f32 %v831_v24, 0.0  ;;  %v474_v15 = vsel %vm461_vm0, %v471_v16, %v473_v63  ;;  %v476_v28 = vsel %vm461_vm0, %v473_v63, %v475_v8  ;;  %v731_v9 = vrot.slane %v4464_v7, 5 }
 0x105   : > { %v496_v47 = vadd.f32 %v474_v15, %v4366_v17  ;;  %v497_v48 = vadd.f32 %v476_v28, %v433_v31  ;;  %v767_v29 = vmul.f32 %v4228_v60, %v406_v52  ;;  %v538_v53 = vsel %vm525_vm1, %v535_v22, %v537_v34  ;;  %v421_v22 = vpop.permute.xlu1 %420 }
 0x106   : > { %v849_v36 = vpack.c.bf16 %v841_v21, %v840_v26  ;;  %v540_v13 = vsel %vm525_vm1, %v537_v34, %v539_v1  ;;  %v665_v16 = vrot.slane %v639_v6, 4  ;;  %v795_v62 = vrot.slane %v4467_v4, 6 }
 0x107   : > { %v560_v11 = vadd.f32 %v538_v53, %v496_v47  ;;  %v561_v42 = vadd.f32 %v540_v13, %v497_v48  ;;  %v729_v3 = vrot.slane %v703_v10, 5  ;;  %v602_v26 = vsel %vm589_vm2, %v599_v5, %v601_v35  ;;  %v416_v47 = vpop.permute.xlu0 %415 }
 0x108   : > { %v863_v27 = vshrl.u32 %v849_v36, 16  ;;  %v866_v17 = vshll.u32 %v849_v36, 16  ;;  %v604_v14 = vsel %vm589_vm2, %v601_v35, %v603_v2  ;;  %v832_v52 = vadd.f32 %v4347_v25, %v815_v37 }
 0x109   : > { %v624_v33 = vadd.f32 %v602_v26, %v560_v11  ;;  %v625_v43 = vadd.f32 %v604_v14, %v561_v42  ;;  %v793_v12 = vrot.slane %v767_v29, 6  ;;  %v666_v63 = vsel %vm653_vm3, %v663_v40, %v665_v16 }
 0x10a   : > { %v865_v24 = vrot.slane %v863_v27, 6  ;;  %v868_v31 = vrot.slane %v866_v17, 7  ;;  %v668_v30 = vsel %vm653_vm3, %v665_v16, %v667_v19  ;;  %v730_v6 = vsel %vm717_vm4, %v727_v61, %v729_v3 }
 0x10b   : > { %v688_v5 = vadd.f32 %v666_v63, %v624_v33  ;;  %v689_v34 = vadd.f32 %v668_v30, %v625_v43  ;;  %v450_v37 = vmul.f32 %v4214_v54, %v421_v22  ;;  %v732_v38 = vsel %vm717_vm4, %v729_v3, %v731_v9 }
 0x10c   : > { %v4508_v10 = vor.u32 %v868_v31, %v865_v24  ;;  %v514_v40 = vmul.f32 %v4216_v55, %v421_v22  ;;  %v578_v21 = vmul.f32 %v4218_v56, %v421_v22  ;;  %v436_v28 = vmul.f32 %v4222_v57, %v421_v22 }
 0x10d   : > { %v752_v15 = vadd.f32 %v730_v6, %v688_v5  ;;  %v479_v35 = vrot.slane %v450_v37, 1  ;;  %v642_v39 = vmul.f32 %v4224_v58, %v421_v22  ;;  %v842_v61 = vmax.f32 %v832_v52, 0.0 }
 0x10e   : > { %v4520_v48 = vsel %vm853_vm9, %v4428_v44, %v4508_v10  ;;  %v753_v29 = vadd.f32 %v732_v38, %v689_v34  ;;  %v794_v36 = vsel %vm781_vm5, %v791_v18, %v793_v12  ;;  %v543_v16 = vrot.slane %v514_v40, 2 }
 0x10f   : > { %v816_v53 = vadd.f32 %v794_v36, %v752_v15  ;;  %v500_v13 = vadd.f32 %v479_v35, %v436_v28  ;;  %v706_v11 = vmul.f32 %v4226_v59, %v421_v22  ;;  %v796_v42 = vsel %vm781_vm5, %v793_v12, %v795_v62 }
 0x110   : > { %v607_v3 = vrot.slane %v578_v21, 3  ;;  %v449_v27 = vmul.f32 %v4214_v54, %v416_v47  ;;  %v513_v44 = vmul.f32 %v4216_v55, %v416_v47  ;;  %v671_v23 = vrot.slane %v642_v39, 4 }
 0x111   : > { %v833_v17 = vadd.f32 %v4347_v25, %v816_v53  ;;  %v564_v26 = vadd.f32 %v543_v16, %v500_v13  ;;  %v577_v18 = vmul.f32 %v4218_v56, %v416_v47  ;;  %v817_v14 = vadd.f32 %v796_v42, %v753_v29 }
 0x112   : > { %v477_v52 = vrot.slane %v449_v27, 1  ;;  %v541_v33 = vrot.slane %v513_v44, 2  ;;  %v641_v43 = vmul.f32 %v4224_v58, %v416_v47  ;;  %v735_v63 = vrot.slane %v706_v11, 5 }
 0x113   : > { %v843_v24 = vmax.f32 %v833_v17, 0.0  ;;  %v628_v31 = vadd.f32 %v607_v3, %v564_v26  ;;  %v435_v12 = vmul.f32 %v4222_v57, %v416_v47  ;;  %v770_v54 = vmul.f32 %v4228_v60, %v421_v22 }
 0x114   : > { %v478_v55 = vsel %vm461_vm0, %v475_v8, %v477_v52  ;;  %v480_v30 = vsel %vm461_vm0, %v477_v52, %v479_v35  ;;  %v605_v5 = vrot.slane %v577_v18, 3  ;;  %v542_v58 = vsel %vm525_vm1, %v539_v1, %v541_v33  ;;  %v920_v1 = vld [vmem:[#allocation2] sm:$0x3] }
 0x115   : > { %v850_v56 = vpack.c.bf16 %v843_v24, %v842_v61  ;;  %v692_v34 = vadd.f32 %v671_v23, %v628_v31  ;;  %v498_v6 = vadd.f32 %v478_v55, %v4450_v32  ;;  %v499_v37 = vadd.f32 %v480_v30, %v435_v12  ;;  %v3754_v52 = vld [vmem:[#allocation4 + $0x100] ss:$8 sps:$4 sm:$0xff]   ;;  %v3761_v55 = vld [vmem:[#allocation4 + $0x110] ss:$8 sps:$4 sm:$0xff]  }
 0x116   : > { %v544_v57 = vsel %vm525_vm1, %v541_v33, %v543_v16  ;;  %v669_v38 = vrot.slane %v641_v43, 4  ;;  %v705_v22 = vmul.f32 %v4226_v59, %v416_v47  ;;  %v799_v15 = vrot.slane %v770_v54, 6  ;;  %v3763_v43 = vld [vmem:[#allocation4 + $0x114] ss:$8 sps:$4 sm:$0xff]  }
 0x117   : > { %v872_v41 = vshrl.u32 %v850_v56, 16  ;;  %v875_v40 = vshll.u32 %v850_v56, 16  ;;  %v756_v8 = vadd.f32 %v735_v63, %v692_v34  ;;  %v562_v21 = vadd.f32 %v542_v58, %v498_v6  ;;  %v3850_v33 = vld [vmem:[#allocation7 + $0x50] sm:$0xff]  }
 0x118   : > { %v563_v28 = vadd.f32 %v544_v57, %v499_v37  ;;  %v606_v32 = vsel %vm589_vm2, %v603_v2, %v605_v5  ;;  %v733_v35 = vrot.slane %v705_v22, 5  ;;  %v608_v61 = vsel %vm589_vm2, %v605_v5, %v607_v3 }
 0x119   : > { %v874_v39 = vrot.slane %v872_v41, 6  ;;  %v877_v59 = vrot.slane %v875_v40, 7  ;;  %v626_v29 = vadd.f32 %v606_v32, %v562_v21  ;;  %v820_v36 = vadd.f32 %v799_v15, %v756_v8 }
 0x11a   : > { %v627_v53 = vadd.f32 %v608_v61, %v563_v28  ;;  %v670_v51 = vsel %vm653_vm3, %v667_v19, %v669_v38  ;;  %v769_v2 = vmul.f32 %v4228_v60, %v416_v47  ;;  %v672_v16 = vsel %vm653_vm3, %v669_v38, %v671_v23  ;;  %v3766_v38 = vld [vmem:[#allocation4 + $0x124] ss:$8 sps:$4 sm:$0xff]   ;;  %v3769_v61 = vld [vmem:[#allocation4 + $0x134] ss:$8 sps:$4 sm:$0xff]  }
 0x11b   : > { %v4560_v13 = vor.u32 %v877_v59, %v874_v39  ;;  %v690_v11 = vadd.f32 %v670_v51, %v626_v29  ;;  %v921_v42 = vsel %vm4551_vm10, 0, %v920_v1  ;;  %v734_v3 = vsel %vm717_vm4, %v731_v9, %v733_v35  ;;  %v915_v51 = vld [vmem:[#allocation2 + $0x20] sm:$0x7f] }
 0x11c   : > { %v691_v27 = vadd.f32 %v672_v16, %v627_v53  ;;  %v797_v44 = vrot.slane %v769_v2, 6  ;;  %922 = vst [vmem:[#allocation2] sm:$0x3] %v921_v42  ;;  %v736_v60 = vsel %vm717_vm4, %v733_v35, %v735_v63  ;;  %v837_v47 = vadd.f32 %v4347_v25, %v820_v36  ;;  %v3764_v35 = vld [vmem:[#allocation4 + $0x120] ss:$8 sps:$4 sm:$0xff]  }
 0x11d   : > { %v879_v20 = vsel %vm853_vm9, %v4508_v10, %v4560_v13  ;;  %v754_v19 = vadd.f32 %v734_v3, %v690_v11  ;;  %v834_v7 = vadd.f32 %v4347_v25, %v817_v14  ;;  %v988_v30 = vshll.u32 %v4520_v48, 16  ;;  %v3767_v11 = vld [vmem:[#allocation4 + $0x130] ss:$8 sps:$4 sm:$0xff]  }
 0x11e   : > { %910 = vst [vmem:[#allocation2 + $0x10] sm:$0xff] %v879_v20  ;;  %v755_v17 = vadd.f32 %v736_v60, %v691_v27  ;;  %v798_v26 = vsel %vm781_vm5, %v795_v62, %v797_v44  ;;  %v800_v9 = vsel %vm781_vm5, %v797_v44, %v799_v15  ;;  %v847_v4 = vmax.f32 %v837_v47, 0.0  ;;  %v3772_v44 = vld [vmem:[#allocation4 + $0x144] ss:$8 sps:$4 sm:$0xff]  }
 0x11f   : > { %v818_v23 = vadd.f32 %v798_v26, %v754_v19  ;;  %v844_v24 = vmax.f32 %v834_v7, 0.0  ;;  %vm979_vm2 = vsmask.f32 7424  ;;  %v990_v15 = vrot.slane %v988_v30, 1 }
 0x120   : > { %v819_v10 = vadd.f32 %v800_v9, %v755_v17  ;;  %vm913_vm3 = vsmask.f32 6400  ;;  %v992_v36 = vshrl.u32 %v4520_v48, 16  ;;  %v1597_v27 = vrot.slane %v988_v30, 2  ;;  %v3773_v30 = vld [vmem:[#allocation4 + $0x150] ss:$8 sps:$4 sm:$0xff]  }
 0x121   : > { %v835_v18 = vadd.f32 %v4347_v25, %v818_v23  ;;  %vm4599_vm4 = vmand %vm461_vm0, %vm913_vm3  ;;  %v1827_v9 = vrot.slane %v4520_v48, 2 }
 0x122   : > { %v836_v62 = vadd.f32 %v4347_v25, %v819_v10  ;;  %v1596_v47 = vrot.slane %v992_v36, 1  ;;  %v994_v10 = vor.u32 %v992_v36, %v990_v15  ;;  %v1374_v36 = vrot.slane %v4520_v48, 1 }
 0x123   : > { %v845_v31 = vmax.f32 %v835_v18, 0.0  ;;  %v940_v63 = vld [vmem:[#allocation2] sm:$0xff] }
 0x124   : > { %v846_v12 = vmax.f32 %v836_v62, 0.0  ;;  %v983_v54 = vshll.u32 %v940_v63, 16  ;;  %1300 = vmatmul.mubr.bf16.vlgmr.msra.gmra.mrb[0].mxu0 %v940_v63  ;;  %v981_v6 = vshrl.u32 %v940_v63, 16  ;;  %v3775_v62 = vld [vmem:[#allocation4 + $0x154] ss:$8 sps:$4 sm:$0xff]  }
 0x125   : > { %v925_v5 = vld [vmem:[#allocation2 + $0x10] sm:$0xe]  ;;  %v931_v56 = vld [vmem:[#allocation2 + $0x10] sm:$0x30]  ;;  %v851_v34 = vpack.c.bf16 %v845_v31, %v844_v24  ;;  %1468 = vmatpush1.bf16.msra.mxu0 %v3754_v52  ;;  %1309 = vmatprep.mubr.bf16.mxu0 %v4016_v0  ;;  %v3770_v52 = vld [vmem:[#allocation4 + $0x140] ss:$8 sps:$4 sm:$0xff]  }
 0x126   : > { %v926_v25 = vsel %vm4580_vm14, 0, %v925_v5  ;;  %v932_v37 = vsel %vm4585_vm15, 0, %v931_v56  ;;  %v852_v58 = vpack.c.bf16 %v847_v4, %v846_v12  ;;  %v985_v57 = vrot.slane %v983_v54, 1  ;;  %1469 = vmatprep.subr.bf16.mxu0 %v3763_v43 }
 0x127   : > { %927 = vst [vmem:[#allocation2 + $0x10] sm:$0xe] %v926_v25  ;;  %933 = vst [vmem:[#allocation2 + $0x10] sm:$0x30] %v932_v37  ;;  %v881_v22 = vshrl.u32 %v851_v34, 16  ;;  %v884_v41 = vshll.u32 %v851_v34, 16  ;;  %v4629_v12 = vor.u32 %v1597_v27, %v1596_v47 }
 0x128   : > { %v890_v40 = vshrl.u32 %v852_v58, 16  ;;  %v893_v8 = vshll.u32 %v852_v58, 16  ;;  %v986_v21 = vor.u32 %v985_v57, %v981_v6  ;;  %v3778_v34 = vld [vmem:[#allocation4 + $0x164] ss:$8 sps:$4 sm:$0xff]  }
 0x129   : > { %v883_v28 = vrot.slane %v881_v22, 6  ;;  %v886_v32 = vrot.slane %v884_v41, 7  ;;  %1470 = vmatpush1.bf16.msra.mxu0 %v3761_v55  ;;  %v3776_v22 = vld [vmem:[#allocation4 + $0x160] ss:$8 sps:$4 sm:$0xff]   ;;  %v3781_v41 = vld [vmem:[#allocation4 + $0x174] ss:$8 sps:$4 sm:$0xff]  }
 0x12a   : > { %v892_v1 = vrot.slane %v890_v40, 6  ;;  %v895_v39 = vrot.slane %v893_v8, 7  ;;  %v991_v59 = vsel %vm979_vm2, %v986_v21, %v990_v15  ;;  %1471 = vmatprep.subr.bf16.mxu0 %v3766_v38  ;;  %v3779_v8 = vld [vmem:[#allocation4 + $0x170] ss:$8 sps:$4 sm:$0xff]   ;;  %v3784_v21 = vld [vmem:[#allocation4 + $0x184] ss:$8 sps:$4 sm:$0xff]  }
 0x12b   : > { %v887_v29 = vor.u32 %v886_v32, %v883_v28  ;;  %1137 = vmatmul.mubr.bf16.vlgmr.msra.gmra.mrb[0].mxu1 %v991_v59  ;;  %v3790_v27 = vld [vmem:[#allocation4 + $0x1a4] ss:$8 sps:$4 sm:$0xff]  }
 0x12c   : > { %v896_v2 = vor.u32 %v895_v39, %v892_v1  ;;  %1310 = vmatmul.mubr.bf16.gmra.mrb[4].mxu0 %v4520_v48  ;;  %1146 = vmatprep.mubr.bf16.mxu1 %v4016_v0  ;;  %v1350_v39 = vld [vmem:[#allocation2] sm:$0xfe] }
 0x12d   : > { %v4607_v16 = vsel %vm853_vm9, %v4560_v13, %v887_v29  ;;  %1472 = vmatpush1.bf16.msra.mxu0 %v3764_v35  ;;  %1319 = vmatprep.mubr.bf16.mxu0 %v4016_v0  ;;  %v3796_v47 = vld [vmem:[#allocation4 + $0x1c4] ss:$8 sps:$4 sm:$0xff]  }
 0x12e   : > { %v897_v42 = vsel %vm853_vm9, %v887_v29, %v896_v2  ;;  %1473 = vmatprep.subr.bf16.mxu0 %v3769_v61  ;;  %v4611_v3 = vld [vmem:[#allocation2 + $0x10] sm:$0xff]  ;;  %v1004_v20 = vshll.u32 %v4607_v16, 16  ;;  %v1008_v60 = vshrl.u32 %v4607_v16, 16  ;;  %v1831_v63 = vrot.slane %v4607_v16, 2  ;;  %v3782_v29 = vld [vmem:[#allocation4 + $0x180] ss:$8 sps:$4 sm:$0xff]  }
 0x12f   : > { %v916_v19 = vsel %vm4599_vm4, %v897_v42, %v915_v51  ;;  %v996_v13 = vshll.u32 %v4611_v3, 16  ;;  %v1000_v17 = vshrl.u32 %v4611_v3, 16  ;;  %v1829_v23 = vrot.slane %v4611_v3, 2  ;;  %v3787_v51 = vld [vmem:[#allocation4 + $0x194] ss:$8 sps:$4 sm:$0xff]  }
 0x130   : > { %917 = vst [vmem:[#allocation2 + $0x20] sm:$0x7f] %v916_v19  ;;  %v1604_v26 = vrot.slane %v1008_v60, 1  ;;  %v1605_v7 = vrot.slane %v1004_v20, 2  ;;  %v1006_v38 = vrot.slane %v1004_v20, 1  ;;  %v1373_v61 = vrot.slane %v1350_v39, 1 }
 0x131   : > { %v998_v18 = vrot.slane %v996_v13, 1  ;;  %1474 = vmatpush1.bf16.msra.mxu0 %v3767_v11  ;;  %v1600_v4 = vrot.slane %v1000_v17, 1  ;;  %v1601_v43 = vrot.slane %v996_v13, 2  ;;  %v4624_v24 = vsel %vm525_vm1, %v1827_v9, %v1829_v23  ;;  %v3785_v42 = vld [vmem:[#allocation4 + $0x190] ss:$8 sps:$4 sm:$0xff]  }
 0x132   : > { %1475 = vmatprep.subr.bf16.mxu0 %v3772_v44  ;;  %v4631_v55 = vor.u32 %v1605_v7, %v1604_v26  ;;  %v4641_v56 = vsel %vm525_vm1, %v1829_v23, %v1831_v63  ;;  %v1010_v32 = vor.u32 %v1008_v60, %v1006_v38  ;;  %v1375_v2 = vsel %vm461_vm0, %v1373_v61, %v1374_v36  ;;  %v3788_v20 = vld [vmem:[#allocation4 + $0x1a0] ss:$8 sps:$4 sm:$0xff]   ;;  %v3793_v60 = vld [vmem:[#allocation4 + $0x1b4] ss:$8 sps:$4 sm:$0xff]   ;;  %v3791_v13 = vld [vmem:[#allocation4 + $0x1b0] ss:$8 sps:$4 sm:$0xff]  }
 0x133   : > { %v999_v31 = vsel %vm979_vm2, %v994_v10, %v998_v18  ;;  %v1602_v54 = vor.u32 %v1601_v43, %v1600_v4  ;;  %v1002_v37 = vor.u32 %v1000_v17, %v998_v18  ;;  %v1376_v44 = vrot.slane %v4611_v3, 1  ;;  %v3794_v26 = vld [vmem:[#allocation4 + $0x1c0] ss:$8 sps:$4 sm:$0xff]   ;;  %v3799_v7 = vld [vmem:[#allocation4 + $0x1d4] ss:$8 sps:$4 sm:$0xff]  }
 0x134   : > { %1147 = vmatmul.mubr.bf16.gmra.mrb[4].mxu1 %v999_v31  ;;  %1320 = vmatmul.mubr.bf16.gmra.mrb[8].mxu0 %v4611_v3  ;;  %v1378_v17 = vrot.slane %v4607_v16, 1  ;;  %v3797_v23 = vld [vmem:[#allocation4 + $0x1d0] ss:$8 sps:$4 sm:$0xff]   ;;  %v3802_v10 = vld [vmem:[#allocation4 + $0x1e4] ss:$8 sps:$4 sm:$0xff]   ;;  %vm2095_vm9 = vcmask 1040384  }
 0x135   : > { %1476 = vmatpush1.bf16.msra.mxu0 %v3770_v52  ;;  %1156 = vmatprep.mubr.bf16.mxu1 %v4016_v0  ;;  %v4646_v6 = vsel %vm913_vm3, %v4629_v12, %v1602_v54  ;;  %v4650_v25 = vsel %vm913_vm3, %v1602_v54, %v4631_v55  ;;  %v1007_v40 = vsel %vm979_vm2, %v1002_v37, %v1006_v38  ;;  %v3800_v52 = vld [vmem:[#allocation4 + $0x1e0] ss:$8 sps:$4 sm:$0xff]   ;;  %v3805_v4 = vld [vmem:[#allocation4 + $0x1f4] ss:$8 sps:$4 sm:$0xff]   ;;  %v3803_v43 = vld [vmem:[#allocation4 + $0x1f0] ss:$8 sps:$4 sm:$0xff]  }
 0x136   : > { %1329 = vmatprep.mubr.bf16.mxu0 %v4016_v0  ;;  %1477 = vmatprep.subr.bf16.mxu0 %v3775_v62  ;;  %v1377_v19 = vsel %vm461_vm0, %v1374_v36, %v1376_v44  ;;  %v1379_v3 = vsel %vm461_vm0, %v1376_v44, %v1378_v17  ;;  %v3808_v31 = vld [vmem:[#allocation4 + $0x204] ss:$8 sps:$4 sm:$0xff]   ;;  %v1589_v54 = vshrl.u32 %v1350_v39, 16  ;;  %v3811_v38 = vld [vmem:[#allocation4 + $0x214] ss:$8 sps:$4 sm:$0xff]  }
 0x137   : > { %v937_v58 = vld [vmem:[#allocation2 + $0x20] sm:$0xe0] }
 0x138   : > { %v938_v57 = vsel %vm4634_vm8, 0, %v937_v58 }
 0x139   : > { %1478 = vmatpush1.bf16.msra.mxu0 %v3773_v30  ;;  %939 = vst [vmem:[#allocation2 + $0x20] sm:$0xe0] %v938_v57  ;;  %v1592_v30 = vshll.u32 %v1350_v39, 16  ;;  %v3806_v57 = vld [vmem:[#allocation4 + $0x200] ss:$8 sps:$4 sm:$0xff]  }
 0x13a   : > { %1479 = vmatprep.subr.bf16.mxu0 %v3778_v34  ;;  %v1591_v34 = vrot.slane %v1589_v54, 1  ;;  %v3823_v39 = vld [vmem:[#allocation4 + $0x254] ss:$8 sps:$4 sm:$0xff]  }
 0x13b   : > { %v1594_v37 = vrot.slane %v1592_v30, 2  ;;  %v3840_v30 = vld [vmem:[#allocation7 + $0xe8] sm:$0xff]  }
 0x13c   : > { %1157 = vmatmul.mubr.bf16.gmra.mrb[8].mxu1 %v1007_v40  ;;  %1330 = vmatmul.mubr.bf16.gmra.mrb[12].mxu0 %v4607_v16  ;;  %v3814_v40 = vld [vmem:[#allocation4 + $0x224] ss:$8 sps:$4 sm:$0xff]  }
 0x13d   : > { %1166 = vmatprep.mubr.bf16.mxu1 %v4016_v0  ;;  %1480 = vmatpush1.bf16.msra.mxu0 %v3776_v22  ;;  %v1595_v58 = vor.u32 %v1594_v37, %v1591_v34  ;;  %v3841_v37 = vld [vmem:[#allocation7 + $0xa8] sm:$0xff]  }
 0x13e   : > { %1339 = vmatprep.mubr.bf16.mxu0 %v4016_v0  ;;  %1481 = vmatprep.subr.bf16.mxu0 %v3781_v41  ;;  %v3809_v41 = vld [vmem:[#allocation4 + $0x210] ss:$8 sps:$4 sm:$0xff]  }
 0x13f   : > { %v1599_v22 = vsel %vm913_vm3, %v1595_v58, %v4629_v12  ;;  %v3820_v12 = vld [vmem:[#allocation4 + $0x244] ss:$8 sps:$4 sm:$0xff]   ;;  %v3842_v58 = vld [vmem:[#allocation7 + $0xf0] sm:$0xff]  }
 0x140   : > { %v4658_v15 = vld [vmem:[#allocation2 + $0x20] sm:$0x7f] }
 0x141   : > { %v1012_v28 = vshll.u32 %v4658_v15, 16  ;;  %1482 = vmatpush1.bf16.msra.mxu0 %v3779_v8  ;;  %v944_v1 = vld [vmem:[#allocation2 + $0x20] sm:$0x3f]  ;;  %v1016_v53 = vshrl.u32 %v4658_v15, 16  ;;  %v1380_v18 = vrot.slane %v4658_v15, 1 }
 0x142   : > { %1702 = vmatprep.subr.bf16.mxu0 %v3784_v21  ;;  %v3812_v8 = vld [vmem:[#allocation4 + $0x220] ss:$8 sps:$4 sm:$0xff]   ;;  %v3817_v21 = vld [vmem:[#allocation4 + $0x234] ss:$8 sps:$4 sm:$0xff]  }
 0x143   : > { %v1014_v35 = vrot.slane %v1012_v28, 1  ;;  %v1381_v62 = vsel %vm461_vm0, %v1378_v17, %v1380_v18  ;;  %v1570_v15 = vld [vmem:[#allocation2 + $0x20] sm:$0xff]  ;;  %v3815_v28 = vld [vmem:[#allocation4 + $0x230] ss:$8 sps:$4 sm:$0xff]  }
 0x144   : > { %1340 = vmatmul.mubr.bf16.gmra.mrb[16].mxu0 %v944_v1  ;;  %v3818_v1 = vld [vmem:[#allocation4 + $0x240] ss:$8 sps:$4 sm:$0xff]  }
 0x145   : > { %v1015_v59 = vsel %vm979_vm2, %v1010_v32, %v1014_v35  ;;  %1499 = vmatprep.mubr.bf16.mxu0 %v4016_v0  ;;  %v1018_v11 = vor.u32 %v1016_v53, %v1014_v35  ;;  %v1609_v32 = vshrl.u32 %v1570_v15, 16  ;;  %v1612_v35 = vshll.u32 %v1570_v15, 16  ;;  %v3824_v53 = vld [vmem:[#allocation4 + $0x260] ss:$8 sps:$4 sm:$0xff]  }
 0x146   : > { %1167 = vmatmul.mubr.bf16.gmra.mrb[12].mxu1 %v1015_v59 }
 0x147   : > { %1176 = vmatprep.mubr.bf16.mxu1 %v4016_v0  ;;  %v1611_v59 = vrot.slane %v1609_v32, 1  ;;  %v1614_v61 = vrot.slane %v1612_v35, 2 }
 0x149   : > { %v1615_v36 = vor.u32 %v1614_v61, %v1611_v59 }
 0x14c   : > { %1500 = vmatmul.mubr.bf16.vlgmr.msra.gmra.mrb[0].mxu0 %v1375_v2  ;;  %v1616_v2 = vsel %vm913_vm3, %v4631_v55, %v1615_v36  ;;  %v1833_v55 = vrot.slane %v1570_v15, 2  ;;  %v3846_v15 = vld [vmem:[#allocation7 + $0x40] sm:$0xff]  }
 0x14d   : > { %1703 = vmatpush1.bf16.msra.mxu0 %v3782_v29  ;;  %1509 = vmatprep.mubr.bf16.mxu0 %v4016_v0  ;;  %v3826_v29 = vld [vmem:[#allocation4 + $0x264] ss:$8 sps:$4 sm:$0xff]  }
 0x14e   : > { %1177 = vmatmul.mubr.bf16.gmra.mrb[16].mxu1 %v1018_v11  ;;  %1704 = vmatprep.subr.bf16.mxu0 %v3787_v51  ;;  %v3829_v51 = vld [vmem:[#allocation4 + $0x274] ss:$8 sps:$4 sm:$0xff]   ;;  %v3827_v11 = vld [vmem:[#allocation4 + $0x270] ss:$8 sps:$4 sm:$0xff]   ;;  %v1834_v44 = vsel %vm525_vm1, %v1831_v63, %v1833_v55  ;;  %v3833_v63 = vld [vmem:[#allocation7 + $0x88] sm:$0xff]  }
 0x151   : > { %1705 = vmatpush1.bf16.msra.mxu0 %v3785_v42 }
 0x152   : > { %1706 = vmatprep.subr.bf16.mxu0 %v3790_v27 }
 0x154   : > { %1510 = vmatmul.mubr.bf16.gmra.mrb[4].mxu0 %v1377_v19  ;;  %v3831_v19 = vld [vmem:[#allocation7 + $0x80] sm:$0xff]  }
 0x155   : > { %1707 = vmatpush1.bf16.msra.mxu0 %v3788_v20  ;;  %1519 = vmatprep.mubr.bf16.mxu0 %v4016_v0 }
 0x156   : > { %1708 = vmatprep.subr.bf16.mxu0 %v3793_v60 }
 0x159   : > { %1709 = vmatpush1.bf16.msra.mxu0 %v3791_v13  ;;  %v3832_v13 = vld [vmem:[#allocation7 + $0xc8] sm:$0xff]  }
 0x15a   : > { %1710 = vmatprep.subr.bf16.mxu0 %v3796_v47 }
 0x15c   : > { %1520 = vmatmul.mubr.bf16.gmra.mrb[8].mxu0 %v1379_v3 }
 0x15d   : > { %1711 = vmatpush1.bf16.msra.mxu0 %v3794_v26  ;;  %1529 = vmatprep.mubr.bf16.mxu0 %v4016_v0  ;;  %v3835_v26 = vld [vmem:[#allocation7 + $0x90] sm:$0xff]  }
 0x15e   : > { %1712 = vmatprep.subr.bf16.mxu0 %v3799_v7 }
 0x161   : > { %1713 = vmatpush1.bf16.msra.mxu0 %v3797_v23 }
 0x162   : > { %1714 = vmatprep.subr.bf16.mxu0 %v3802_v10 }
 0x164   : > { %1530 = vmatmul.mubr.bf16.gmra.mrb[12].mxu0 %v1381_v62 }
 0x165   : > { %1715 = vmatpush1.bf16.msra.mxu0 %v3800_v52  ;;  %1539 = vmatprep.mubr.bf16.mxu0 %v4016_v0  ;;  %v3837_v52 = vld [vmem:[#allocation7 + $0x98] sm:$0xff]  }
 0x166   : > { %1716 = vmatprep.subr.bf16.mxu0 %v3805_v4  ;;  %v3838_v4 = vld [vmem:[#allocation7 + $0xe0] sm:$0xff]  }
 0x169   : > { %1717 = vmatpush1.bf16.msra.mxu0 %v3803_v43 }
 0x16a   : > { %1920 = vmatprep.subr.bf16.mxu0 %v3808_v31  ;;  %v3839_v31 = vld [vmem:[#allocation7 + $0xa0] sm:$0xff]  }
 0x16c   : > { %1540 = vmatmul.mubr.bf16.gmra.mrb[16].mxu0 %v1380_v18  ;;  %v3836_v18 = vld [vmem:[#allocation7 + $0xd8] sm:$0xff]  }
 0x16d   : > { %1734 = vmatprep.mubr.bf16.mxu0 %v4016_v0 }
 0x174   : > { %1735 = vmatmul.mubr.bf16.vlgmr.msra.gmra.mrb[0].mxu0 %v1599_v22  ;;  %v3843_v22 = vld [vmem:[#allocation7 + $0xb0] sm:$0xff]  }
 0x175   : > { %1921 = vmatpush1.bf16.msra.mxu0 %v3806_v57  ;;  %1744 = vmatprep.mubr.bf16.mxu0 %v4016_v0 }
 0x176   : > { %1922 = vmatprep.subr.bf16.mxu0 %v3811_v38 }
 0x179   : > { %1923 = vmatpush1.bf16.msra.mxu0 %v3809_v41 }
 0x17a   : > { %1924 = vmatprep.subr.bf16.mxu0 %v3814_v40 }
 0x17c   : > { %1745 = vmatmul.mubr.bf16.gmra.mrb[4].mxu0 %v4646_v6  ;;  %v3821_v6 = vld [vmem:[#allocation4 + $0x250] ss:$8 sps:$4 sm:$0xff]  }
 0x17d   : > { %1925 = vmatpush1.bf16.msra.mxu0 %v3812_v8  ;;  %1754 = vmatprep.mubr.bf16.mxu0 %v4016_v0  ;;  %v3844_v8 = vld [vmem:[#allocation7 + $0xf8] sm:$0xff]  }
 0x17e   : > { %1926 = vmatprep.subr.bf16.mxu0 %v3817_v21  ;;  %v3845_v21 = vld [vmem:[#allocation7 + $0xb8] sm:$0xff]  }
 0x181   : > { %1927 = vmatpush1.bf16.msra.mxu0 %v3815_v28  ;;  %v2023_v28 = vld [vmem:[%s5043_s4] sm:$0x3] }
 0x182   : > { %1928 = vmatprep.subr.bf16.mxu0 %v3820_v12  ;;  %v4740_v12 = vrot.slane %v2023_v28, %v425_v50  ;;  %v4744_v35 = vrot.slane %v2023_v28, %v439_v46 }
 0x184   : > { %1755 = vmatmul.mubr.bf16.gmra.mrb[8].mxu0 %v4650_v25  ;;  %v1805_v25 = vld [vmem:[#allocation2] sm:$0xfc] }
 0x185   : > { %1929 = vmatpush1.bf16.msra.mxu0 %v3818_v1  ;;  %1764 = vmatprep.mubr.bf16.mxu0 %v4016_v0  ;;  %v1826_v42 = vrot.slane %v1805_v25, 2 }
 0x186   : > { %1930 = vmatprep.subr.bf16.mxu0 %v3823_v39 }
 0x187   : > { %v1828_v27 = vsel %vm525_vm1, %v1826_v42, %v1827_v9 }
 0x189   : > { %1931 = vmatpush1.bf16.msra.mxu0 %v3821_v6 }
 0x18a   : > { %1932 = vmatprep.subr.bf16.mxu0 %v3826_v29 }
 0x18c   : > { %1765 = vmatmul.mubr.bf16.gmra.mrb[12].mxu0 %v1616_v2 }
 0x18d   : > { %1933 = vmatpush1.bf16.msra.mxu0 %v3824_v53  ;;  %1774 = vmatprep.mubr.bf16.mxu0 %v4016_v0 }
 0x18e   : > { %1934 = vmatprep.subr.bf16.mxu0 %v3829_v51 }
 0x191   : > { %1935 = vmatpush1.bf16.msra.mxu0 %v3827_v11 }
 0x194   : > { %1775 = vmatmul.mubr.bf16.gmra.mrb[16].mxu0 %v1615_v36 }
 0x195   : > { %1952 = vmatprep.mubr.bf16.mxu0 %v4016_v0 }
 0x19c   : > { %1953 = vmatmul.mubr.bf16.vlgmr.msra.gmra.mrb[0].mxu0 %v1828_v27 }
 0x19d   : > { %1962 = vmatprep.mubr.bf16.mxu0 %v4016_v0 }
 0x1a4   : > { %1963 = vmatmul.mubr.bf16.gmra.mrb[4].mxu0 %v4624_v24  ;;  %v3830_v24 = vld [vmem:[#allocation7 + $0xc0] sm:$0xff]  }
 0x1a5   : > { %1972 = vmatprep.mubr.bf16.mxu0 %v4016_v0  ;;  %3345 = vmatprep.subr.bf16.mxu1 %v3830_v24 }
 0x1a6   : > { %3346 = vmatpush3.bf16.msra.mxu1 %v3831_v19 }
 0x1a7   : > { %3347 = vmatprep.subr.bf16.mxu1 %v3832_v13 }
 0x1aa   : > { %3348 = vmatpush3.bf16.msra.mxu1 %v3833_v63 }
 0x1ac   : > { %1973 = vmatmul.mubr.bf16.gmra.mrb[8].mxu0 %v4641_v56 }
 0x1ad   : > { %1982 = vmatprep.mubr.bf16.mxu0 %v4016_v0 }
 0x1b4   : > { %1983 = vmatmul.mubr.bf16.gmra.mrb[12].mxu0 %v1834_v44 }
 0x1b5   : > { %1992 = vmatprep.mubr.bf16.mxu0 %v4016_v0  ;;  %v3834_v0 = vld [vmem:[#allocation7 + $0xd0] sm:$0xff]  }
 0x1b6   : > { %3349 = vmatprep.subr.bf16.mxu1 %v3834_v0 }
 0x1b7   : > { %3350 = vmatpush3.bf16.msra.mxu1 %v3835_v26 }
 0x1b8   : > { %3351 = vmatprep.subr.bf16.mxu1 %v3836_v18 }
 0x1bb   : > { %3352 = vmatpush3.bf16.msra.mxu1 %v3837_v52 }
 0x1bc   : > { %1993 = vmatmul.mubr.bf16.gmra.mrb[16].mxu0 %v1833_v55  ;;  %3353 = vmatprep.subr.bf16.mxu1 %v3838_v4 }
 0x1bf   : > { %3354 = vmatpush3.bf16.msra.mxu1 %v3839_v31 }
 0x1c0   : > { %3355 = vmatprep.subr.bf16.mxu1 %v3840_v30 }
 0x1c3   : > { %3356 = vmatpush3.bf16.msra.mxu1 %v3841_v37 }
 0x1c4   : > { %3357 = vmatprep.subr.bf16.mxu1 %v3842_v58 }
 0x1c7   : > { %3358 = vmatpush3.bf16.msra.mxu1 %v3843_v22 }
 0x1c8   : > { %3359 = vmatprep.subr.bf16.mxu1 %v3844_v8 }
 0x1cb   : > { %3360 = vmatpush3.bf16.msra.mxu1 %v3845_v21 }
 0x1cc   : > { %3391 = vmatprep.subr.bf16.mxu1 %v3846_v15 }
 0x1fe   : > { %v1138_v48 = vpop.f32.mrb[0].mxu1 }
 0x1ff   : > { %v1140_v9 = vpop.f32.mrb[1].mxu1 }
 0x200   : > { %v1142_v20 = vpop.f32.mrb[2].mxu1 }
 0x201   : > { %v4701_v60 = vpop.f32.mrb[3].mxu1 }
 0x207   : > { %v4703_v56 = vpop.f32.mrb[4].mxu1 }
 0x208   : > { %v4705_v47 = vpop.f32.mrb[5].mxu1 }
 0x209   : > { %v4707_v16 = vpop.f32.mrb[6].mxu1 }
 0x20a   : > { %v4709_v17 = vpop.f32.mrb[7].mxu1 }
 0x20f   : > { %v4711_v7 = vpop.f32.mrb[8].mxu1 }
 0x210   : > { %v4713_v3 = vpop.f32.mrb[9].mxu1 }
 0x211   : > { %v4715_v23 = vpop.f32.mrb[10].mxu1 }
 0x212   : > { %v4717_v10 = vpop.f32.mrb[11].mxu1 }
 0x219   : > { %v4719_v62 = vpop.f32.mrb[12].mxu1 }
 0x21a   : > { %v4721_v43 = vpop.f32.mrb[13].mxu1 }
 0x21b   : > { %v4723_v54 = vpop.f32.mrb[14].mxu1 }
 0x21c   : > { %v4725_v34 = vpop.f32.mrb[15].mxu1 }
 0x221   : > { %v4727_v57 = vpop.f32.mrb[16].mxu1 }
 0x222   : > { %v4729_v38 = vpop.f32.mrb[17].mxu1 }
 0x223   : > { %v4731_v41 = vpop.f32.mrb[18].mxu1 }
 0x224   : > { %v4733_v40 = vpop.f32.mrb[19].mxu1 }
 0x26f   : > { %v1954_v32 = vpop.f32.mrb[0].mxu0 }
 0x270   : > { %v3559_v1 = vadd.f32 %v1954_v32, %v1138_v48  ;;  %v1956_v39 = vpop.f32.mrb[1].mxu0 }
 0x271   : > { %v3560_v59 = vadd.f32 %v1956_v39, %v1140_v9  ;;  %v1958_v61 = vpop.f32.mrb[2].mxu0 }
 0x272   : > { %v2035_v6 = vadd.f32 %v3559_v1, %v4740_v12  ;;  %v3561_v29 = vadd.f32 %v1958_v61, %v1142_v20  ;;  %v1960_v36 = vpop.f32.mrb[3].mxu0 }
 0x273   : > { %v2036_v53 = vadd.f32 %v3560_v59, %v4744_v35  ;;  %v3562_v51 = vadd.f32 %v1960_v36, %v4701_v60 }
 0x274   : > { %v2037_v50 = vadd.f32 %v3561_v29, %v4740_v12  ;;  %v2055_v11 = vmax.f32 %v2035_v6, 0.0 }
 0x275   : > { %v2038_v2 = vadd.f32 %v3562_v51, %v4744_v35  ;;  %v2056_v46 = vmax.f32 %v2036_v53, 0.0 }
 0x276   : > { %v2057_v45 = vmax.f32 %v2037_v50, 0.0 }
 0x277   : > { %v2058_v25 = vmax.f32 %v2038_v2, 0.0  ;;  %v1964_v42 = vpop.f32.mrb[4].mxu0 }
 0x278   : > { %v2075_v27 = vpack.c.bf16 %v2057_v45, %v2055_v11  ;;  %v3563_v55 = vadd.f32 %v1964_v42, %v4703_v56  ;;  %v1966_v44 = vpop.f32.mrb[5].mxu0 }
 0x279   : > { %v2076_v48 = vpack.c.bf16 %v2058_v25, %v2056_v46  ;;  %v3564_v9 = vadd.f32 %v1966_v44, %v4705_v47  ;;  %v1968_v20 = vpop.f32.mrb[6].mxu0 }
 0x27a   : > { %v2096_v24 = vrot.slane %v2075_v27, 7  ;;  %v2039_v60 = vadd.f32 %v3563_v55, %v4740_v12  ;;  %v3565_v19 = vadd.f32 %v1968_v20, %v4707_v16  ;;  %v1970_v13 = vpop.f32.mrb[7].mxu0 }
 0x27b   : > { %v2097_v63 = vrot.slane %v2076_v48, 7  ;;  %v2040_v0 = vadd.f32 %v3564_v9, %v4744_v35  ;;  %v3566_v26 = vadd.f32 %v1970_v13, %v4709_v17 }
 0x27c   : > { %2124 = vst [vmem:[#allocation3] sm:$0xfe] %v2096_v24  ;;  %v2041_v18 = vadd.f32 %v3565_v19, %v4740_v12  ;;  %v2059_v52 = vmax.f32 %v2039_v60, 0.0 }
 0x27d   : > { %2125 = vst [vmem:[#allocation3 + $0x8] sm:$0xfe] %v2097_v63  ;;  %v2042_v56 = vadd.f32 %v3566_v26, %v4744_v35  ;;  %v2060_v4 = vmax.f32 %v2040_v0, 0.0 }
 0x27e   : > { %v2061_v47 = vmax.f32 %v2041_v18, 0.0 }
 0x27f   : > { %v2062_v31 = vmax.f32 %v2042_v56, 0.0  ;;  %v1974_v30 = vpop.f32.mrb[8].mxu0 }
 0x280   : > { %v2077_v37 = vpack.c.bf16 %v2061_v47, %v2059_v52  ;;  %v3567_v16 = vadd.f32 %v1974_v30, %v4711_v7  ;;  %v1976_v58 = vpop.f32.mrb[9].mxu0 }
 0x281   : > { %v2078_v22 = vpack.c.bf16 %v2062_v31, %v2060_v4  ;;  %v3568_v8 = vadd.f32 %v1976_v58, %v4713_v3  ;;  %v1978_v17 = vpop.f32.mrb[10].mxu0 }
 0x282   : > { %v2098_v21 = vrot.slane %v2077_v37, 7  ;;  %v2043_v15 = vadd.f32 %v3567_v16, %v4740_v12  ;;  %v3569_v28 = vadd.f32 %v1978_v17, %v4715_v23  ;;  %v1980_v32 = vpop.f32.mrb[11].mxu0 }
 0x283   : > { %v2134_v1 = vld [vmem:[#allocation3] sm:$0x3]  ;;  %v2100_v39 = vrot.slane %v2078_v22, 7  ;;  %v2044_v59 = vadd.f32 %v3568_v8, %v4744_v35  ;;  %v3570_v61 = vadd.f32 %v1980_v32, %v4717_v10 }
 0x284   : > { %v2135_v7 = vsel %vm4551_vm10, 0, %v2134_v1  ;;  %v2137_v6 = vld [vmem:[#allocation3 + $0x8] sm:$0x3]  ;;  %v4768_v29 = vsel %vm2095_vm9, %v2096_v24, %v2098_v21  ;;  %v2045_v3 = vadd.f32 %v3569_v28, %v4740_v12  ;;  %v2063_v10 = vmax.f32 %v2043_v15, 0.0 }
 0x285   : > { %2136 = vst [vmem:[#allocation3] sm:$0x3] %v2135_v7  ;;  %v2138_v23 = vsel %vm4551_vm10, 0, %v2137_v6  ;;  %v4774_v36 = vsel %vm2095_vm9, %v2097_v63, %v2100_v39  ;;  %v2046_v53 = vadd.f32 %v3570_v61, %v4744_v35  ;;  %v2064_v50 = vmax.f32 %v2044_v59, 0.0 }
 0x286   : > { %2139 = vst [vmem:[#allocation3 + $0x8] sm:$0x3] %v2138_v23  ;;  %v2065_v51 = vmax.f32 %v2045_v3, 0.0  ;;  %v2243_v30 = vshll.u32 %v4768_v29, 16 }
 0x287   : > { %v2066_v2 = vmax.f32 %v2046_v53, 0.0  ;;  %v1984_v11 = vpop.f32.mrb[12].mxu0 }
 0x288   : > { %v2079_v45 = vpack.c.bf16 %v2065_v51, %v2063_v10  ;;  %v3571_v46 = vadd.f32 %v1984_v11, %v4719_v62  ;;  %v1986_v25 = vpop.f32.mrb[13].mxu0 }
 0x289   : > { %v2080_v42 = vpack.c.bf16 %v2066_v2, %v2064_v50  ;;  %v3572_v27 = vadd.f32 %v1986_v25, %v4721_v43  ;;  %v1988_v49 = vpop.f32.mrb[14].mxu0  ;;  %v2245_v2 = vrot.slane %v2243_v30, 1 }
 0x28a   : > { %v2102_v55 = vrot.slane %v2079_v45, 7  ;;  %v2047_v44 = vadd.f32 %v3571_v46, %v4740_v12  ;;  %v3573_v48 = vadd.f32 %v1988_v49, %v4723_v54  ;;  %v1990_v9 = vpop.f32.mrb[15].mxu0  ;;  %v2255_v54 = vshll.u32 %v4774_v36, 16 }
 0x28b   : > { %v2104_v20 = vrot.slane %v2080_v42, 7  ;;  %v2048_v24 = vadd.f32 %v3572_v27, %v4744_v35  ;;  %v3574_v60 = vadd.f32 %v1990_v9, %v4725_v34 }
 0x28c   : > { %v2103_v19 = vsel %vm2095_vm9, %v2098_v21, %v2102_v55  ;;  %v2049_v62 = vadd.f32 %v3573_v48, %v4740_v12  ;;  %v4785_v13 = vld [vmem:[#allocation3] sm:$0xff]  ;;  %v2067_v26 = vmax.f32 %v2047_v44, 0.0  ;;  %v4798_v28 = vrot.slane %v2255_v54, 1  ;;  %v3848_v44 = vld [vmem:[#allocation7 + $0x48] sm:$0xff]  }
 0x28d   : > { %2128 = vst [vmem:[#allocation3 + $0x20] sm:$0xff] %v2103_v19  ;;  %v2105_v43 = vsel %vm2095_vm9, %v2100_v39, %v2104_v20  ;;  %v2050_v63 = vadd.f32 %v3574_v60, %v4744_v35  ;;  %v4789_v0 = vld [vmem:[#allocation3 + $0x8] sm:$0xff]  ;;  %v2238_v56 = vshll.u32 %v4785_v13, 16  ;;  %v2068_v52 = vmax.f32 %v2048_v24, 0.0  ;;  %v3849_v60 = vld [vmem:[#allocation7 + $0x8] sm:$0xff]   ;;  %v3851_v54 = vld [vmem:[#allocation7 + $0x10] sm:$0xff]  }
 0x28e   : > { %2129 = vst [vmem:[#allocation3 + $0x28] sm:$0xff] %v2105_v43  ;;  %v2069_v18 = vmax.f32 %v2049_v62, 0.0  ;;  %v2250_v34 = vshll.u32 %v4789_v0, 16  ;;  %v2248_v31 = vshrl.u32 %v4789_v0, 16  ;;  %v2236_v32 = vshrl.u32 %v4785_v13, 16 }
 0x28f   : > { %v2070_v47 = vmax.f32 %v2050_v63, 0.0  ;;  %v1994_v4 = vpop.f32.mrb[16].mxu0  ;;  %v2240_v8 = vrot.slane %v2238_v56, 1  ;;  %v3852_v56 = vld [vmem:[#allocation7 + $0x58] sm:$0xff]  }
 0x290   : > { %v2081_v37 = vpack.c.bf16 %v2069_v18, %v2067_v26  ;;  %v3575_v16 = vadd.f32 %v1994_v4, %v4727_v57  ;;  %v1996_v58 = vpop.f32.mrb[17].mxu0  ;;  %v2252_v22 = vrot.slane %v2250_v34, 1  ;;  %v2267_v18 = vshrl.u32 %v4774_v36, 16 }
 0x291   : > { %v2082_v17 = vpack.c.bf16 %v2070_v47, %v2068_v52  ;;  %v3576_v21 = vadd.f32 %v1996_v58, %v4729_v38  ;;  %v1998_v15 = vpop.f32.mrb[18].mxu0  ;;  %v2241_v23 = vor.u32 %v2240_v8, %v2236_v32  ;;  %v2710_v52 = vrot.slane %v4774_v36, 1  ;;  %v3853_v32 = vld [vmem:[#allocation7 + $0x18] sm:$0xff]  }
 0x292   : > { %v2106_v1 = vrot.slane %v2081_v37, 7  ;;  %v2051_v39 = vadd.f32 %v3575_v16, %v4740_v12  ;;  %v3577_v59 = vadd.f32 %v1998_v15, %v4731_v41  ;;  %v2000_v61 = vpop.f32.mrb[19].mxu0  ;;  %v2253_v7 = vor.u32 %v2252_v22, %v2248_v31  ;;  %v3847_v41 = vld [vmem:[#allocation7] sm:$0xff]  }
 0x293   : > { %v2108_v6 = vrot.slane %v2082_v17, 7  ;;  %v2052_v57 = vadd.f32 %v3576_v21, %v4744_v35  ;;  %v3578_v3 = vadd.f32 %v2000_v61, %v4733_v40  ;;  %v2269_v37 = vor.u32 %v2267_v18, %v4798_v28 }
 0x294   : > { %v2140_v53 = vld [vmem:[#allocation3 + $0x20] sm:$0xe]  ;;  %v2146_v38 = vld [vmem:[#allocation3 + $0x20] sm:$0x30]  ;;  %v4806_v10 = vsel %vm2095_vm9, %v2102_v55, %v2106_v1  ;;  %v2053_v51 = vadd.f32 %v3577_v59, %v4740_v12  ;;  %v2258_v50 = vsel %vm979_vm2, %v2253_v7, %v4798_v28  ;;  %v2071_v49 = vmax.f32 %v2051_v39, 0.0  ;;  %v3854_v59 = vld [vmem:[#allocation7 + $0x60] sm:$0xff]  }
 0x295   : > { %v2141_v11 = vsel %vm4580_vm14, 0, %v2140_v53  ;;  %v2147_v45 = vsel %vm4585_vm15, 0, %v2146_v38  ;;  %v2143_v40 = vld [vmem:[#allocation3 + $0x28] sm:$0xe]  ;;  %v2149_v46 = vld [vmem:[#allocation3 + $0x28] sm:$0x30]  ;;  %v4816_v25 = vsel %vm2095_vm9, %v2104_v20, %v2108_v6  ;;  %v2054_v42 = vadd.f32 %v3578_v3, %v4744_v35  ;;  %2451 = vmatprep.mubr.bf16.mxu1 %v2258_v50 }
 0x296   : > { %2142 = vst [vmem:[#allocation3 + $0x20] sm:$0xe] %v2141_v11  ;;  %2148 = vst [vmem:[#allocation3 + $0x20] sm:$0x30] %v2147_v45  ;;  %v2144_v12 = vsel %vm4580_vm14, 0, %v2143_v40  ;;  %v2150_v27 = vsel %vm4585_vm15, 0, %v2149_v46  ;;  %v2246_v20 = vsel %vm979_vm2, %v2241_v23, %v2245_v2 }
 0x297   : > { %v2073_v55 = vmax.f32 %v2053_v51, 0.0  ;;  %2145 = vst [vmem:[#allocation3 + $0x28] sm:$0xe] %v2144_v12  ;;  %2151 = vst [vmem:[#allocation3 + $0x28] sm:$0x30] %v2150_v27  ;;  %v2072_v48 = vmax.f32 %v2052_v57, 0.0  ;;  %2452 = vmatmul.mubr.bf16.vlgmr.msra.gmra.mrb[20].mxu1 %v2246_v20 }
 0x298   : > { %v2074_v9 = vmax.f32 %v2054_v42, 0.0  ;;  %3392 = vmatpush3.bf16.msra.mxu1 %v3847_v41  ;;  %v2287_v4 = vshll.u32 %v4816_v25, 16  ;;  %v2718_v30 = vrot.slane %v4816_v25, 1  ;;  %v2259_v16 = vshrl.u32 %v4768_v29, 16  ;;  %v3855_v51 = vld [vmem:[#allocation7 + $0x20] sm:$0xff]   ;;  %v3856_v50 = vld [vmem:[#allocation7 + $0x68] sm:$0xff]  }
 0x299   : > { %v2083_v24 = vpack.c.bf16 %v2073_v55, %v2071_v49  ;;  %3393 = vmatprep.subr.bf16.mxu1 %v3848_v44  ;;  %v2279_v38 = vshll.u32 %v4806_v10, 16  ;;  %v3857_v11 = vld [vmem:[#allocation7 + $0x28] sm:$0xff]   ;;  %v3858_v45 = vld [vmem:[#allocation7 + $0x70] sm:$0xff]   ;;  %v2299_v27 = vshrl.u32 %v4816_v25, 16  ;;  %v3860_v55 = vld [vmem:[#allocation7 + $0x78] sm:$0xff]  }
 0x29a   : > { %v2084_v35 = vpack.c.bf16 %v2074_v9, %v2072_v48  ;;  %v2261_v15 = vor.u32 %v2259_v16, %v2245_v2  ;;  %v2289_v39 = vrot.slane %v2287_v4, 1  ;;  %v3859_v12 = vld [vmem:[#allocation7 + $0x30] sm:$0xff]   ;;  %v2291_v48 = vshrl.u32 %v4806_v10, 16  ;;  %v3865_v4 = vld [vmem:[#allocation7 + $0x108] sm:$0xff]   ;;  %v3870_v16 = vld [vmem:[#allocation7 + $0x160] sm:$0xff]  }
 0x29b   : > { %v2110_v19 = vrot.slane %v2083_v24, 7  ;;  %v2281_v41 = vrot.slane %v2279_v38, 1  ;;  %v3001_v38 = vld [vmem:[%s5046_s7 + $0x10] sm:$0xff] }
 0x29c   : > { %v2112_v62 = vrot.slane %v2084_v35, 7  ;;  %3394 = vmatpush3.bf16.msra.mxu1 %v3849_v60  ;;  %v2301_v20 = vor.u32 %v2299_v27, %v2289_v39  ;;  %v3005_v27 = vld [vmem:[%s5046_s7 + $0x30] sm:$0xff] }
 0x29d   : > { %v2111_v14 = vsel %vm2095_vm9, %v2106_v1, %v2110_v19  ;;  %v4826_v63 = vld [vmem:[#allocation3 + $0x20] sm:$0xff]  ;;  %3395 = vmatprep.subr.bf16.mxu1 %v3850_v33  ;;  %v2293_v19 = vor.u32 %v2291_v48, %v2281_v41  ;;  %v3861_v33 = vld [vmem:[#allocation7 + $0x38] sm:$0xff]   ;;  %v3008_v48 = vld [vmem:[%s5046_s7 + $0x48] sm:$0xff] }
 0x29e   : > { %2132 = vst [vmem:[#allocation3 + $0x40] sm:$0x7f] %v2111_v14  ;;  %v2113_v43 = vsel %vm2095_vm9, %v2108_v6, %v2112_v62  ;;  %v4828_v26 = vld [vmem:[#allocation3 + $0x28] sm:$0xff]  ;;  %v2263_v34 = vshll.u32 %v4826_v63, 16  ;;  %v2275_v53 = vshrl.u32 %v4826_v63, 16 }
 0x29f   : > { %2133 = vst [vmem:[#allocation3 + $0x48] sm:$0x7f] %v2113_v43  ;;  %v2271_v47 = vshll.u32 %v4828_v26, 16  ;;  %v2714_v31 = vrot.slane %v4828_v26, 1  ;;  %v2283_v8 = vshrl.u32 %v4828_v26, 16  ;;  %v3862_v43 = vld [vmem:[#allocation7 + $0x140] sm:$0xff]  }
 0x2a0   : > { %v2265_v58 = vrot.slane %v2263_v34, 1  ;;  %3396 = vmatpush3.bf16.msra.mxu1 %v3851_v54 }
 0x2a1   : > { %v2273_v22 = vrot.slane %v2271_v47, 1  ;;  %v4843_v17 = vsel %vm461_vm0, %v2710_v52, %v2714_v31  ;;  %v4846_v21 = vsel %vm461_vm0, %v2714_v31, %v2718_v30  ;;  %3397 = vmatprep.subr.bf16.mxu1 %v3852_v56  ;;  %v3863_v56 = vld [vmem:[#allocation7 + $0x100] sm:$0xff]   ;;  %v3864_v47 = vld [vmem:[#allocation7 + $0x148] sm:$0xff]   ;;  %v3866_v31 = vld [vmem:[#allocation7 + $0x150] sm:$0xff]  }
 0x2a2   : > { %v2266_v7 = vsel %vm979_vm2, %v2261_v15, %v2265_v58  ;;  %v2277_v2 = vor.u32 %v2275_v53, %v2265_v58  ;;  %v3872_v58 = vld [vmem:[#allocation7 + $0x168] sm:$0xff]   ;;  %v3875_v15 = vld [vmem:[#allocation7 + $0x130] sm:$0xff]  }
 0x2a3   : > { %v2274_v28 = vsel %vm979_vm2, %v2269_v37, %v2273_v22  ;;  %v2285_v1 = vor.u32 %v2283_v8, %v2273_v22  ;;  %v3868_v37 = vld [vmem:[#allocation7 + $0x158] sm:$0xff]   ;;  %v3873_v22 = vld [vmem:[#allocation7 + $0x128] sm:$0xff]   ;;  %v3874_v8 = vld [vmem:[#allocation7 + $0x170] sm:$0xff]  }
 0x2a4   : > { %2459 = vmatprep.mubr.bf16.mxu1 %v2274_v28  ;;  %3398 = vmatpush3.bf16.msra.mxu1 %v3853_v32  ;;  %v2282_v40 = vsel %vm979_vm2, %v2277_v2, %v2281_v41  ;;  %v2662_v28 = vld [vmem:[#allocation3 + $0x8] sm:$0xfe] }
 0x2a5   : > { %v2152_v61 = vld [vmem:[#allocation3 + $0x40] sm:$0xe0]  ;;  %2460 = vmatmul.mubr.bf16.gmra.mrb[24].mxu1 %v2266_v7  ;;  %v2290_v3 = vsel %vm979_vm2, %v2285_v1, %v2289_v39  ;;  %3399 = vmatprep.subr.bf16.mxu1 %v3854_v59  ;;  %v3877_v1 = vld [vmem:[#allocation7 + $0x138] sm:$0xff]   ;;  %v2709_v39 = vrot.slane %v2662_v28, 1 }
 0x2a6   : > { %v2153_v6 = vsel %vm4634_vm8, 0, %v2152_v61  ;;  %v2155_v57 = vld [vmem:[#allocation3 + $0x48] sm:$0xe0]  ;;  %2467 = vmatprep.mubr.bf16.mxu1 %v2290_v3  ;;  %v2661_v61 = vld [vmem:[#allocation3] sm:$0xfe]  ;;  %v2712_v3 = vrot.slane %v4826_v63, 1 }
 0x2a7   : > { %2154 = vst [vmem:[#allocation3 + $0x40] sm:$0xe0] %v2153_v6  ;;  %v2156_v23 = vsel %vm4634_vm8, 0, %v2155_v57  ;;  %v2706_v7 = vrot.slane %v2661_v61, 1  ;;  %v2707_v6 = vrot.slane %v4768_v29, 1 }
 0x2a8   : > { %2157 = vst [vmem:[#allocation3 + $0x48] sm:$0xe0] %v2156_v23  ;;  %3400 = vmatpush3.bf16.msra.mxu1 %v3855_v51  ;;  %v3002_v51 = vld [vmem:[%s5046_s7 + $0x18] sm:$0xff] }
 0x2a9   : > { %3401 = vmatprep.subr.bf16.mxu1 %v3856_v50  ;;  %v2708_v57 = vsel %vm461_vm0, %v2706_v7, %v2707_v6  ;;  %v2713_v23 = vsel %vm461_vm0, %v2707_v6, %v2712_v3  ;;  %v3539_v50 = vpack.c.bf16 %v3002_v51, %v3001_v38 }
 0x2ac   : > { %3402 = vmatpush3.bf16.msra.mxu1 %v3857_v11 }
 0x2ad   : > { %2468 = vmatmul.mubr.bf16.gmra.mrb[28].mxu1 %v2282_v40  ;;  %3403 = vmatprep.subr.bf16.mxu1 %v3858_v45  ;;  %v3003_v40 = vld [vmem:[%s5046_s7 + $0x20] sm:$0xff] }
 0x2ae   : > { %v4858_v5 = vld [vmem:[#allocation3 + $0x40] sm:$0xff] }
 0x2af   : > { %v4860_v46 = vld [vmem:[#allocation3 + $0x48] sm:$0xff]  ;;  %v2295_v42 = vshll.u32 %v4858_v5, 16  ;;  %v2307_v18 = vshrl.u32 %v4858_v5, 16  ;;  %v2166_v59 = vld [vmem:[#allocation3 + $0x40] sm:$0x7f] }
 0x2b0   : > { %v2303_v49 = vshll.u32 %v4860_v46, 16  ;;  %v2722_v44 = vrot.slane %v4860_v46, 1  ;;  %v2310_v35 = vshrl.u32 %v4860_v46, 16  ;;  %3404 = vmatpush3.bf16.msra.mxu1 %v3859_v12  ;;  %v2167_v32 = vld [vmem:[#allocation3 + $0x48] sm:$0x7f] }
 0x2b1   : > { %v2297_v9 = vrot.slane %v2295_v42, 1  ;;  %3405 = vmatprep.subr.bf16.mxu1 %v3860_v55  ;;  %v3007_v55 = vld [vmem:[%s5046_s7 + $0x40] sm:$0xff] }
 0x2b2   : > { %v2305_v24 = vrot.slane %v2303_v49, 1  ;;  %v4871_v60 = vsel %vm461_vm0, %v2718_v30, %v2722_v44  ;;  %v3867_v30 = vld [vmem:[#allocation7 + $0x110] sm:$0xff]  }
 0x2b3   : > { %v2298_v54 = vsel %vm979_vm2, %v2293_v19, %v2297_v9  ;;  %v2309_v34 = vor.u32 %v2307_v18, %v2297_v9  ;;  %v3006_v49 = vld [vmem:[%s5046_s7 + $0x38] sm:$0xff]  ;;  %v4019_v9 = vmov 0.0   ;;  %v3012_v18 = vld [vmem:[%s5046_s7 + $0x68] sm:$0xff] }
 0x2b4   : > { %v2306_v62 = vsel %vm979_vm2, %v2301_v20, %v2305_v24  ;;  %v2312_v14 = vor.u32 %v2310_v35, %v2305_v24  ;;  %3406 = vmatpush3.bf16.msra.mxu1 %v3861_v33  ;;  %v3548_v20 = vpack.c.bf16 %v3008_v48, %v3007_v55  ;;  %v3009_v24 = vld [vmem:[%s5046_s7 + $0x50] sm:$0xff]  ;;  %v3010_v35 = vld [vmem:[%s5046_s7 + $0x58] sm:$0xff] }
 0x2b5   : > { %2475 = vmatprep.mubr.bf16.mxu1 %v2306_v62  ;;  %3437 = vmatprep.subr.bf16.mxu1 %v3862_v43 }
 0x2b6   : > { %2476 = vmatmul.mubr.bf16.gmra.mrb[32].mxu1 %v2298_v54  ;;  %v3011_v54 = vld [vmem:[%s5046_s7 + $0x60] sm:$0xff] }
 0x2b7   : > { %2483 = vmatprep.mubr.bf16.mxu1 %v2312_v14  ;;  %v3551_v14 = vpack.c.bf16 %v3010_v35, %v3009_v24 }
 0x2be   : > { %2484 = vmatmul.mubr.bf16.gmra.mrb[36].mxu1 %v2309_v34 }
 0x2bf   : > { %2620 = vmatprep.mubr.bf16.mxu1 %v4789_v0  ;;  %v3869_v0 = vld [vmem:[#allocation7 + $0x118] sm:$0xff]  }
 0x2c6   : > { %2621 = vmatmul.mubr.bf16.vlgmr.msra.gmra.mrb[40].mxu1 %v4785_v13  ;;  %v3871_v13 = vld [vmem:[#allocation7 + $0x120] sm:$0xff]  }
 0x2c7   : > { %3438 = vmatpush3.bf16.msra.mxu1 %v3863_v56  ;;  %2628 = vmatprep.mubr.bf16.mxu1 %v4774_v36  ;;  %v2716_v36 = vrot.slane %v4806_v10, 1  ;;  %v3554_v56 = vpack.c.bf16 %v3012_v18, %v3011_v54 }
 0x2c8   : > { %3439 = vmatprep.subr.bf16.mxu1 %v3864_v47  ;;  %v3013_v47 = vld [vmem:[%s5046_s7 + $0x70] sm:$0xff] }
 0x2cb   : > { %3440 = vmatpush3.bf16.msra.mxu1 %v3865_v4  ;;  %v3014_v4 = vld [vmem:[%s5046_s7 + $0x78] sm:$0xff] }
 0x2cc   : > { %3441 = vmatprep.subr.bf16.mxu1 %v3866_v31 }
 0x2ce   : > { %2629 = vmatmul.mubr.bf16.gmra.mrb[44].mxu1 %v4768_v29  ;;  %v2720_v29 = vrot.slane %v4858_v5, 1  ;;  %v3004_v5 = vld [vmem:[%s5046_s7 + $0x28] sm:$0xff] }
 0x2cf   : > { %2636 = vmatprep.mubr.bf16.mxu1 %v4828_v26  ;;  %3442 = vmatpush3.bf16.msra.mxu1 %v3867_v30  ;;  %v3876_v26 = vld [vmem:[#allocation7 + $0x178] sm:$0xff]   ;;  %v3542_v42 = vpack.c.bf16 %v3004_v5, %v3003_v40 }
 0x2d0   : > { %3443 = vmatprep.subr.bf16.mxu1 %v3868_v37  ;;  %v2721_v53 = vsel %vm461_vm0, %v2716_v36, %v2720_v29 }
 0x2d3   : > { %3444 = vmatpush3.bf16.msra.mxu1 %v3869_v0 }
 0x2d4   : > { %3445 = vmatprep.subr.bf16.mxu1 %v3870_v16  ;;  %v3557_v16 = vpack.c.bf16 %v3014_v4, %v3013_v47  ;;  %v4962_v4 = vld [vmem:[%s5045_s6] ss:$0 sm:$0xff] }
 0x2d6   : > { %2637 = vmatmul.mubr.bf16.gmra.mrb[48].mxu1 %v4826_v63  ;;  %v2999_v63 = vld [vmem:[%s5046_s7] sm:$0xff] }
 0x2d7   : > { %2644 = vmatprep.mubr.bf16.mxu1 %v4816_v25  ;;  %3446 = vmatpush3.bf16.msra.mxu1 %v3871_v13  ;;  %v2711_v25 = vsel %vm461_vm0, %v2709_v39, %v2710_v52  ;;  %v2717_v52 = vsel %vm461_vm0, %v2712_v3, %v2716_v36  ;;  %vm4018_vm0 = vmmov 0  }
 0x2d8   : > { %3447 = vmatprep.subr.bf16.mxu1 %v3872_v58 }
 0x2db   : > { %3448 = vmatpush3.bf16.msra.mxu1 %v3873_v22 }
 0x2dc   : > { %3449 = vmatprep.subr.bf16.mxu1 %v3874_v8 }
 0x2de   : > { %2645 = vmatmul.mubr.bf16.gmra.mrb[52].mxu1 %v4806_v10  ;;  %v3000_v10 = vld [vmem:[%s5046_s7 + $0x8] sm:$0xff] }
 0x2df   : > { %2652 = vmatprep.mubr.bf16.mxu1 %v2167_v32  ;;  %3450 = vmatpush3.bf16.msra.mxu1 %v3875_v15 }
 0x2e0   : > { %3451 = vmatprep.subr.bf16.mxu1 %v3876_v26 }
 0x2e3   : > { %3452 = vmatpush3.bf16.msra.mxu1 %v3877_v1 }
 0x2e6   : > { %2653 = vmatmul.mubr.bf16.gmra.mrb[56].mxu1 %v2166_v59 }
 0x2e7   : > { %2862 = vmatprep.mubr.bf16.mxu1 %v2711_v25 }
 0x2ee   : > { %2863 = vmatmul.mubr.bf16.vlgmr.msra.gmra.mrb[60].mxu1 %v2708_v57 }
 0x2ef   : > { %2870 = vmatprep.mubr.bf16.mxu1 %v4843_v17  ;;  %v4017_v17 = vmov 0.0|0.0  }
 0x2f0   : > { %3535 = vmatprep.subr.bf16.mxu1 %v4017_v17 }
 0x2f6   : > { %2871 = vmatmul.mubr.bf16.gmra.mrb[64].mxu1 %v2713_v23 }
 0x2f7   : > { %2878 = vmatprep.mubr.bf16.mxu1 %v4846_v21  ;;  %v3536_v21 = vpack.c.bf16 %v3000_v10, %v2999_v63 }
 0x2f9   : > { %3537 = vmatpush3.bf16.msra.mxu1 %v3536_v21 }
 0x2fa   : > { %3538 = vmatprep.subr.bf16.mxu1 %v4017_v17 }
 0x2fd   : > { %3540 = vmatpush3.bf16.msra.mxu1 %v3539_v50 }
 0x2fe   : > { %2879 = vmatmul.mubr.bf16.gmra.mrb[68].mxu1 %v2717_v52  ;;  %3541 = vmatprep.subr.bf16.mxu1 %v4017_v17 }
 0x2ff   : > { %2886 = vmatprep.mubr.bf16.mxu1 %v4871_v60 }
 0x301   : > { %3543 = vmatpush3.bf16.msra.mxu1 %v3542_v42 }
 0x302   : > { %3544 = vmatprep.subr.bf16.mxu1 %v4017_v17 }
 0x306   : > { %2887 = vmatmul.mubr.bf16.gmra.mrb[72].mxu1 %v2721_v53 }
 0x307   : > { %2894 = vmatprep.mubr.bf16.mxu1 %v2722_v44  ;;  %v3545_v44 = vpack.c.bf16 %v3006_v49, %v3005_v27 }
 0x309   : > { %3546 = vmatpush3.bf16.msra.mxu1 %v3545_v44 }
 0x30a   : > { %3547 = vmatprep.subr.bf16.mxu1 %v4017_v17 }
 0x30d   : > { %3549 = vmatpush3.bf16.msra.mxu1 %v3548_v20 }
 0x30e   : > { %2895 = vmatmul.mubr.bf16.gmra.mrb[76].mxu1 %v2720_v29  ;;  %3550 = vmatprep.subr.bf16.mxu1 %v4017_v17 }
 0x30f   : > { %3532 = vmatprep.mubr.msk.f32.mxu1 %vm4018_vm0, %v4019_v9 }
 0x311   : > { %3552 = vmatpush3.bf16.msra.mxu1 %v3551_v14 }
 0x312   : > { %3553 = vmatprep.subr.bf16.mxu1 %v4017_v17 }
 0x315   : > { %3555 = vmatpush3.bf16.msra.mxu1 %v3554_v56 }
 0x316   : > { %3556 = vmatprep.subr.bf16.mxu1 %v4017_v17 }
 0x319   : > { %3558 = vmatpush3.bf16.msra.mxu1 %v3557_v16 }
 0x36a   : > { %v3361_v2 = vpop.f32.mrb[20].mxu1 }
 0x36b   : > { %v3362_v41 = vpop.f32.mrb[21].mxu1 }
 0x36c   : > { %v4912_v11 = vadd.f32 %v3362_v41, %v3361_v2  ;;  %v3364_v45 = vpop.f32.mrb[22].mxu1 }
 0x36d   : > { %v3365_v46 = vpop.f32.mrb[23].mxu1 }
 0x36e   : > { %v3366_v12 = vadd.f32 %v3365_v46, %v3364_v45 }
 0x378   : > { %v3367_v60 = vpop.f32.mrb[24].mxu1 }
 0x379   : > { %v3368_v19 = vpop.f32.mrb[25].mxu1 }
 0x37a   : > { %v3369_v33 = vadd.f32 %v3368_v19, %v3367_v60  ;;  %v3370_v62 = vpop.f32.mrb[26].mxu1 }
 0x37b   : > { %v3371_v43 = vpop.f32.mrb[27].mxu1 }
 0x37c   : > { %v3372_v34 = vadd.f32 %v3371_v43, %v3370_v62 }
 0x380   : > { %v3373_v31 = vpop.f32.mrb[28].mxu1 }
 0x381   : > { %v3374_v30 = vpop.f32.mrb[29].mxu1 }
 0x382   : > { %v3375_v37 = vadd.f32 %v3374_v30, %v3373_v31  ;;  %v3376_v0 = vpop.f32.mrb[30].mxu1 }
 0x383   : > { %v3377_v13 = vpop.f32.mrb[31].mxu1 }
 0x384   : > { %v3378_v58 = vadd.f32 %v3377_v13, %v3376_v0 }
 0x389   : > { %v3379_v22 = vpop.f32.mrb[32].mxu1 }
 0x38a   : > { %v3380_v8 = vpop.f32.mrb[33].mxu1 }
 0x38b   : > { %v3381_v15 = vadd.f32 %v3380_v8, %v3379_v22  ;;  %v3382_v26 = vpop.f32.mrb[34].mxu1 }
 0x38c   : > { %v3383_v32 = vpop.f32.mrb[35].mxu1 }
 0x38d   : > { %v3384_v28 = vadd.f32 %v3383_v32, %v3382_v26 }
 0x391   : > { %v3385_v1 = vpop.f32.mrb[36].mxu1 }
 0x392   : > { %v3386_v39 = vpop.f32.mrb[37].mxu1 }
 0x393   : > { %v3387_v59 = vadd.f32 %v3386_v39, %v3385_v1  ;;  %v3388_v25 = vpop.f32.mrb[38].mxu1 }
 0x394   : > { %v3389_v61 = vpop.f32.mrb[39].mxu1 }
 0x395   : > { %v3390_v7 = vadd.f32 %v3389_v61, %v3388_v25 }
 0x399   : > { %v3407_v6 = vpop.f32.mrb[40].mxu1 }
 0x39a   : > { %v3408_v57 = vpop.f32.mrb[41].mxu1 }
 0x39b   : > { %v3409_v3 = vadd.f32 %v3408_v57, %v3407_v6  ;;  %v3410_v23 = vpop.f32.mrb[42].mxu1 }
 0x39c   : > { %v3411_v36 = vpop.f32.mrb[43].mxu1 }
 0x39d   : > { %v2623_v52 = vadd.f32 %v3409_v3, %v4912_v11  ;;  %v3412_v29 = vadd.f32 %v3411_v36, %v3410_v23 }
 0x39f   : > { %v2626_v53 = vadd.f32 %v3412_v29, %v3366_v12 }
 0x3a1   : > { %v3413_v63 = vpop.f32.mrb[44].mxu1 }
 0x3a2   : > { %v3414_v10 = vpop.f32.mrb[45].mxu1 }
 0x3a3   : > { %v3415_v17 = vadd.f32 %v3414_v10, %v3413_v63  ;;  %v3416_v21 = vpop.f32.mrb[46].mxu1 }
 0x3a4   : > { %v3417_v38 = vpop.f32.mrb[47].mxu1 }
 0x3a5   : > { %v2631_v51 = vadd.f32 %v3415_v17, %v3369_v33  ;;  %v3418_v50 = vadd.f32 %v3417_v38, %v3416_v21 }
 0x3a7   : > { %v2634_v2 = vadd.f32 %v3418_v50, %v3372_v34 }
 0x3a9   : > { %v3419_v41 = vpop.f32.mrb[48].mxu1 }
 0x3aa   : > { %v3420_v45 = vpop.f32.mrb[49].mxu1 }
 0x3ab   : > { %v3421_v40 = vadd.f32 %v3420_v45, %v3419_v41  ;;  %v3422_v5 = vpop.f32.mrb[50].mxu1 }
 0x3ac   : > { %v3423_v46 = vpop.f32.mrb[51].mxu1 }
 0x3ad   : > { %v2639_v42 = vadd.f32 %v3421_v40, %v3375_v37  ;;  %v3424_v27 = vadd.f32 %v3423_v46, %v3422_v5 }
 0x3af   : > { %v2642_v49 = vadd.f32 %v3424_v27, %v3378_v58 }
 0x3b1   : > { %v3425_v55 = vpop.f32.mrb[52].mxu1 }
 0x3b2   : > { %v3426_v11 = vpop.f32.mrb[53].mxu1 }
 0x3b3   : > { %v3427_v44 = vadd.f32 %v3426_v11, %v3425_v55  ;;  %v3428_v12 = vpop.f32.mrb[54].mxu1 }
 0x3b4   : > { %v3429_v48 = vpop.f32.mrb[55].mxu1 }
 0x3b5   : > { %v4951_v9 = vadd.f32 %v3427_v44, %v3381_v15  ;;  %v3430_v20 = vadd.f32 %v3429_v48, %v3428_v12 }
 0x3b7   : > { %v4953_v24 = vadd.f32 %v3430_v20, %v3384_v28 }
 0x3b9   : > { %v3431_v35 = vpop.f32.mrb[56].mxu1 }
 0x3ba   : > { %v3432_v60 = vpop.f32.mrb[57].mxu1 }
 0x3bb   : > { %v3433_v19 = vadd.f32 %v3432_v60, %v3431_v35  ;;  %v3434_v33 = vpop.f32.mrb[58].mxu1 }
 0x3bc   : > { %v3435_v62 = vpop.f32.mrb[59].mxu1 }
 0x3bd   : > { %v4955_v14 = vadd.f32 %v3433_v19, %v3387_v59  ;;  %v3436_v43 = vadd.f32 %v3435_v62, %v3434_v33 }
 0x3bf   : > { %v4957_v54 = vadd.f32 %v3436_v43, %v3390_v7 }
 0x3c1   : > { %v3453_v18 = vpop.f32.mrb[60].mxu1 }
 0x3c2   : > { %v3454_v34 = vpop.f32.mrb[61].mxu1 }
 0x3c3   : > { %v3455_v56 = vadd.f32 %v3454_v34, %v3453_v18  ;;  %v3456_v47 = vpop.f32.mrb[62].mxu1 }
 0x3c4   : > { %v3457_v31 = vpop.f32.mrb[63].mxu1 }
 0x3c5   : > { %v2903_v30 = vadd.f32 %v3455_v56, %v2623_v52  ;;  %v3458_v37 = vadd.f32 %v3457_v31, %v3456_v47 }
 0x3c7   : > { %v2920_v0 = vadd.f32 %v4962_v4, %v2903_v30  ;;  %v2904_v16 = vadd.f32 %v3458_v37, %v2626_v53 }
 0x3c9   : > { %v2930_v13 = vmax.f32 %v2920_v0, 0.0  ;;  %v2921_v58 = vadd.f32 %v4962_v4, %v2904_v16  ;;  %v3459_v22 = vpop.f32.mrb[64].mxu1 }
 0x3ca   : > { %v3460_v8 = vpop.f32.mrb[65].mxu1 }
 0x3cb   : > { %v2931_v15 = vmax.f32 %v2921_v58, 0.0  ;;  %v3461_v26 = vadd.f32 %v3460_v8, %v3459_v22  ;;  %v3462_v32 = vpop.f32.mrb[66].mxu1  ;;  %v2945_v1 = vrot.slane %v2930_v13, 2 }
 0x3cc   : > { %v3463_v28 = vpop.f32.mrb[67].mxu1 }
 0x3cd   : > { %v2946_v39 = vrot.slane %v2931_v15, 2  ;;  %v2905_v59 = vadd.f32 %v3461_v26, %v2631_v51  ;;  %v3464_v25 = vadd.f32 %v3463_v28, %v3462_v32 }
 0x3cf   : > { %v2947_v61 = vsel %vm525_vm1, %v2945_v1, %v2946_v39  ;;  %v2922_v7 = vadd.f32 %v4962_v4, %v2905_v59  ;;  %v2906_v6 = vadd.f32 %v3464_v25, %v2634_v2 }
 0x3d1   : > { %v2932_v57 = vmax.f32 %v2922_v7, 0.0  ;;  %v2923_v3 = vadd.f32 %v4962_v4, %v2906_v6  ;;  %v3465_v23 = vpop.f32.mrb[68].mxu1 }
 0x3d2   : > { %v3466_v36 = vpop.f32.mrb[69].mxu1 }
 0x3d3   : > { %v2948_v52 = vrot.slane %v2932_v57, 2  ;;  %v2933_v29 = vmax.f32 %v2923_v3, 0.0  ;;  %v3467_v53 = vadd.f32 %v3466_v36, %v3465_v23  ;;  %v3468_v63 = vpop.f32.mrb[70].mxu1 }
 0x3d4   : > { %v3469_v10 = vpop.f32.mrb[71].mxu1 }
 0x3d5   : > { %v2949_v17 = vsel %vm525_vm1, %v2946_v39, %v2948_v52  ;;  %v2950_v21 = vrot.slane %v2933_v29, 2  ;;  %v2907_v38 = vadd.f32 %v3467_v53, %v2639_v42  ;;  %v3470_v51 = vadd.f32 %v3469_v10, %v3468_v63 }
 0x3d6   : > { %v2958_v50 = vadd.f32 %v2949_v17, %v2947_v61 }
 0x3d7   : > { %v2951_v41 = vsel %vm525_vm1, %v2948_v52, %v2950_v21  ;;  %v2924_v2 = vadd.f32 %v4962_v4, %v2907_v38  ;;  %v2908_v45 = vadd.f32 %v3470_v51, %v2642_v49  ;;  %v3340_v38 = vld [vmem:[%s5047_s8] ss:$0 sm:$0xff] }
 0x3d8   : > { %v2959_v40 = vadd.f32 %v2958_v50, %v2951_v41 }
 0x3d9   : > { %v2934_v5 = vmax.f32 %v2924_v2, 0.0  ;;  %v3471_v46 = vpop.f32.mrb[72].mxu1  ;;  %v2925_v11 = vadd.f32 %v4962_v4, %v2908_v45 }
 0x3da   : > { %v3472_v27 = vpop.f32.mrb[73].mxu1 }
 0x3db   : > { %v2952_v55 = vrot.slane %v2934_v5, 2  ;;  %v3473_v44 = vadd.f32 %v3472_v27, %v3471_v46  ;;  %v3474_v12 = vpop.f32.mrb[74].mxu1  ;;  %v2935_v19 = vmax.f32 %v2925_v11, 0.0 }
 0x3dc   : > { %v3475_v48 = vpop.f32.mrb[75].mxu1 }
 0x3dd   : > { %v2953_v20 = vsel %vm525_vm1, %v2950_v21, %v2952_v55  ;;  %v2909_v42 = vadd.f32 %v3473_v44, %v4951_v9  ;;  %v3476_v35 = vadd.f32 %v3475_v48, %v3474_v12  ;;  %v2974_v56 = vrot.slane %v2935_v19, 2 }
 0x3de   : > { %v2960_v60 = vadd.f32 %v2959_v40, %v2953_v20 }
 0x3df   : > { %v2926_v33 = vadd.f32 %v4962_v4, %v2909_v42  ;;  %v2910_v49 = vadd.f32 %v3476_v35, %v4953_v24 }
 0x3e0   : > { %v2961_v22 = vrot.slane %v2960_v60, 4 }
 0x3e1   : > { %v2936_v62 = vmax.f32 %v2926_v33, 0.0  ;;  %v2927_v43 = vadd.f32 %v4962_v4, %v2910_v49  ;;  %v3477_v18 = vpop.f32.mrb[76].mxu1 }
 0x3e2   : > { %v3478_v34 = vpop.f32.mrb[77].mxu1  ;;  %v2962_v1 = vadd.f32 %v2961_v22, %v2960_v60 }
 0x3e3   : > { %v2975_v47 = vrot.slane %v2936_v62, 2  ;;  %v2937_v31 = vmax.f32 %v2927_v43, 0.0  ;;  %v3479_v30 = vadd.f32 %v3478_v34, %v3477_v18  ;;  %v3480_v37 = vpop.f32.mrb[78].mxu1 }
 0x3e4   : > { %v3481_v0 = vpop.f32.mrb[79].mxu1 }
 0x3e5   : > { %v2976_v9 = vsel %vm525_vm1, %v2974_v56, %v2975_v47  ;;  %v2977_v16 = vrot.slane %v2937_v31, 2  ;;  %v2911_v13 = vadd.f32 %v3479_v30, %v4955_v14  ;;  %v3482_v58 = vadd.f32 %v3481_v0, %v3480_v37 }
 0x3e6   : > { %v2963_v14 = vrot.slane %v2962_v1, 2 }
 0x3e7   : > { %v2978_v24 = vsel %vm525_vm1, %v2975_v47, %v2977_v16  ;;  %v2928_v8 = vadd.f32 %v4962_v4, %v2911_v13  ;;  %v2912_v15 = vadd.f32 %v3482_v58, %v4957_v54 }
 0x3e8   : > { %v2987_v26 = vadd.f32 %v2978_v24, %v2976_v9  ;;  %v2964_v23 = vadd.f32 %v2963_v14, %v2962_v1 }
 0x3e9   : > { %v2938_v32 = vmax.f32 %v2928_v8, 0.0  ;;  %v2929_v28 = vadd.f32 %v4962_v4, %v2912_v15 }
 0x3ea   : > { %v2965_v52 = vrot.slane %v2964_v23, 1 }
 0x3eb   : > { %v2979_v39 = vrot.slane %v2938_v32, 2  ;;  %v2939_v59 = vmax.f32 %v2929_v28, 0.0 }
 0x3ec   : > { %v2966_v53 = vadd.f32 %v2965_v52, %v2964_v23 }
 0x3ed   : > { %v2980_v25 = vsel %vm525_vm1, %v2977_v16, %v2979_v39  ;;  %v2981_v61 = vrot.slane %v2939_v59, 2 }
 0x3ee   : > { %v2988_v7 = vadd.f32 %v2987_v26, %v2980_v25  ;;  %v2968_v10 = vmul.f32 0.03125, %v2966_v53 }
 0x3ef   : > { %v2982_v6 = vsel %vm525_vm1, %v2979_v39, %v2981_v61 }
 0x3f0   : > { %v2989_v57 = vadd.f32 %v2988_v7, %v2982_v6 }
 0x3f2   : > { %v2990_v3 = vrot.slane %v2989_v57, 4 }
 0x3f4   : > { %v2991_v36 = vadd.f32 %v2990_v3, %v2989_v57 }
 0x3f6   : > { %v2992_v54 = vrot.slane %v2991_v36, 2 }
 0x3f8   : > { %v2993_v29 = vadd.f32 %v2992_v54, %v2991_v36 }
 0x3fa   : > { %v2994_v63 = vrot.slane %v2993_v29, 1 }
 0x3fc   : > { %v2995_v4 = vadd.f32 %v2994_v63, %v2993_v29 }
 0x3fe   : > { %v2996_v17 = vmul.f32 0.03125, %v2995_v4 }
 0x400   : > { %v2998_v21 = vsel %vm2095_vm9, %v2968_v10, %v2996_v17 }
 0x401   : > { %3533 = vmatmul.mubr.f32.vlgmr.msra.gmra.mrb[80].mxu1 %v2998_v21 }
 0x4d4   : > { %v3088_v51 = vpop.f32.mrb[80].mxu1 }
 0x4d5   : > { %v3089_v50 = vadd.f32 %v3340_v38, %v3088_v51  ;;  %v3534_v41 = vpop.f32.mrb[81].mxu1 }
 0x4d7   : > { %v3092_v2 = vsel %vm781_vm5, %v3089_v50, -inf }
 0x4d8   : > { %3093 = vmax.xlane.f32.xlu0 %v3092_v2 }
 0x565   : > { %v3094_v45 = vpop.xlane.xlu0 %3093 }
 0x566   : > { %v3095_v40 = vsub.f32 %v3089_v50, %v3094_v45 }
 0x568   : > { %v3096_v5 = vmul.f32 1.442695, %v3095_v40 }
 0x56a   : > { %3878 = vpow2.f32 %v3096_v5 }
 0x574   : > { %v3879_v46 = vpop.eup %3878 }
 0x575   : > { %v3098_v27 = vsel %vm781_vm5, %v3879_v46, 0.0 }
 0x576   : > { %3099 = vadd.xlane.f32.xlu1 %v3098_v27 }
 0x603   : > { %v3100_v55 = vpop.xlane.xlu1 %3099 }
 0x604   : > { %3880 = vlog2.f32 %v3100_v55 }
 0x60e   : > { %v3881_v11 = vpop.eup %3880 }
 0x60f   : > { %v3102_v44 = vmul.f32 0.6931472, %v3881_v11 }
 0x611   : > { %v3103_v12 = vsub.f32 %v3095_v40, %v3102_v44 }
 0x613   : > { %3104 = vst [vmem:[%s355_s14] sm:$0x3] %v3103_v12 }
 0x614   : > { %3951 = shalt.err (!%p3948_p11)
}
 0x615   : > { %s3952_s27 = scalar_lea.hbm %s4997_s25, 32  ;;  %s3956_s26 = scalar_lea.hbm %s5048_s9, 64 }
 0x616   : > { %p3953_p13 = scmp.ne.s32.totalorder %s4997_s25, %s3952_s27  ;;  %p3957_p6 = scmp.lt.u32.totalorder %s4997_s25, %s5048_s9 }
 0x617   : > { %p3958_p9 = scmp.lt.u32.totalorder %s3956_s26, %s3952_s27  ;;  %p3960_p12 = scmp.lt.u32.totalorder %s3952_s27, %s4997_s25 }
 0x618   : > { %p3954_p0 = pnand %p3953_p13, %p5079_p1 }
 0x619   : > { %p3959_p10 = por %p3958_p9, %p3957_p6 }
 0x61a   : > { %p3955_p5 = pneg %p3954_p0 }
 0x61b   : > { %p3961_p2 = por %p3960_p12, %p3959_p10 }
 0x61d   : > { %p3962_p3 = pnand %p3961_p2, %p3955_p5 }
 0x61f   : > { %3965 = shalt.err (!%p3962_p3)
}
 0x620   : > { %3648 = dma.vmem_to_hbm [thread:$0]  (%p5079_p1), %s4999_s16, 32, %s4997_s25, %s3106_s23  }
 0x621 PF: > { %p3665_p4 = scmp.ge.s32.totalorder %s4008_s12, 2  ;;  %s3131_s14 = sand.u32 1, %s3996_s30  }
 0x622   : > { %p5080_p7 = scmp.ne.s32.totalorder %s5059_s20, 0  ;;  %s3132_s17 = scalar_lea.sflag [#allocation6], %s3131_s14 }
 0x624   : > { %p3658_p8 = pnand %p3665_p4, %p5080_p7 }
 0x626   : > { %3991 = dma.done.wait (!%p3658_p8), %s3132_s17, 32  }
 0x627   : > { %3993 = vsyncadd (!%p3658_p8), %s3132_s17, 4294967264  ;;  %s5081_s12 = sld [smem:[#allocation14_spill]]  ;;  %s5082_s22 = sld [smem:[#allocation13_spill]] }
 0x628   : > { %s5083_s11 = sld [smem:[#allocation15_spill]]  ;;  %s5084_s30 = smov %s4000_s10 }
 0x62d   : > { %p21_p11 = scmp.ge.s32.totalorder %s5081_s12, 4   ;;  %s5085_s10 = smov %s5082_s22 }
 0x62f   :  { %23 = sbr.rel (!%p21_p11) target bundleno = 5 (0x5), region = 106 }
 0x636   :  { %3137 = vsyncpa [#allocation5], 1 }
 0x637   :  { %3139 = vsyncpa [#allocation5 + $0x1], 1 }
 0x638   :  { %3140 = vsyncpa [#allocation8], 1 }
 0x639   :  { %3141 = vsyncpa [#allocation6], 1 }
 0x63a   :  { %3143 = vsyncpa [#allocation6 + $0x1], 1 }

</bundles_post_ra>
